<compile_context>
chip_gen: v5e
topology: v5e:2x2
jax: 0.10.0
libtpu: 0.0.40
codegen_flags: <defaults>
</compile_context>

<pallas_src>
import functools

import jax
import jax.numpy as jnp
from jax import lax
from jax.experimental import pallas as pl
from jax.experimental.pallas import tpu as pltpu


# ----------------------------------------------------------------------------
# Fused kernel: [conv1x1 -> BN(train) -> LeakyReLU(0.2)] x2 for the h branch,
# the same x2 + MaxPool2d(2) for the m branch, then the full reconstructing
# procedure (six matmuls, three global Frobenius norms, tanh, residual adds).
# Everything stays in VMEM between stages.
# ----------------------------------------------------------------------------
def _mfi_fused_kernel(xh_ref, xm_ref, ph1_ref, ph2_ref, pm1_ref, pm2_ref,
                      o_nm_ref, o_mh_ref, o_h_ref):
    B, C, L = o_h_ref.shape          # static block shape
    q = B * L                        # lane width of one pooled corner segment

    def conv_bn_lrelu(x, p_ref):
        # p_ref: (Co, Ci+2) = [conv weight | gamma | beta].  Conv bias is
        # omitted: training-mode BN's mean subtraction cancels it exactly.
        cin = p_ref.shape[1] - 2
        w = p_ref[:, :cin]                                   # (Co, Ci)
        gamma = p_ref[:, cin:cin + 1]                        # (Co, 1)
        beta = p_ref[:, cin + 1:cin + 2]                     # (Co, 1)
        y = jnp.dot(w, x, preferred_element_type=jnp.float32)  # (Co, N)
        # One-pass BatchNorm statistics (biased var), eps=1e-5.
        inv_n = 1.0 / y.shape[-1]
        mean = jnp.sum(y, axis=-1, keepdims=True) * inv_n
        msq = jnp.sum(y * y, axis=-1, keepdims=True) * inv_n
        var = jnp.maximum(msq - mean * mean, 0.0)
        z = (y - mean) * lax.rsqrt(var + 1e-5) * gamma + beta
        return jnp.where(z >= 0, z, 0.2 * z)                 # LeakyReLU(0.2)

    # ---- TransferConv_h : (C, B*L) ------------------------------------
    fh = conv_bn_lrelu(conv_bn_lrelu(xh_ref[...], ph1_ref), ph2_ref)

    # ---- TransferConv_m : (Cm, 4*B*L) -> pooled (C, B*L) ---------------
    zm = conv_bn_lrelu(conv_bn_lrelu(xm_ref[...], pm1_ref), pm2_ref)
    # The four 2x2-window corners are contiguous lane segments of width B*L,
    # so MaxPool2d(2) is three elementwise maxes on static 128-aligned slices.
    fm = jnp.maximum(jnp.maximum(zm[:, 0:q], zm[:, q:2 * q]),
                     jnp.maximum(zm[:, 2 * q:3 * q], zm[:, 3 * q:4 * q]))

    # ---- reconstructing_procedure --------------------------------------
    def dot_tn(a, b):   # a^T @ b, a,b: (c, L) -> (L, L)   (contract channels)
        return lax.dot_general(a, b, (((0,), (0,)), ((), ())),
                               preferred_element_type=jnp.float32)

    def dot_nn(a, m):   # a @ m, a: (c, L), m: (L, L) -> (c, L)
        return lax.dot_general(a, m, (((1,), (0,)), ((), ())),
                               preferred_element_type=jnp.float32)

    def frob_sq(m):     # sum(m*m) as a (1, 1) value (lane then sublane reduce)
        return jnp.sum(jnp.sum(m * m, axis=-1, keepdims=True),
                       axis=-2, keepdims=True)

    fh_b = [fh[:, b * L:(b + 1) * L] for b in range(B)]   # per-batch (c, L)
    fm_b = [fm[:, b * L:(b + 1) * L] for b in range(B)]

    def refine_stage(A, R, D):
        # mats_b = A_b^T @ R_b ; global Frobenius norm over all batches
        # (matches torch.norm of the whole (B,L,L) tensor); refine_b =
        # A_b @ tanh(mats_b / ||.||) + D_b.
        mats = [dot_tn(a, r) for a, r in zip(A, R)]
        tot = frob_sq(mats[0])
        for m in mats[1:]:
            tot = tot + frob_sq(m)
        inv = lax.rsqrt(tot)   # no eps, same zero-input hazard as the reference
        return [dot_nn(a, jnp.tanh(m * inv)) + d for a, m, d in zip(A, mats, D)]

    # f_n := f_h (reproduces the reference's `f_n = f_h.view(...)` aliasing).
    r_nm = refine_stage(fh_b, fm_b, fm_b)   # f_refine_nm
    r_mh = refine_stage(r_nm, fh_b, fh_b)   # f_refine_mh
    r_h = refine_stage(r_mh, fh_b, fh_b)    # f_refine_h

    for b in range(B):
        o_nm_ref[b] = r_nm[b]
        o_mh_ref[b] = r_mh[b]
        o_h_ref[b] = r_h[b]


# ----------------------------------------------------------------------------
# Parameters: conv weight + BN gamma/beta packed into one (Co, Ci+2) array.
# ----------------------------------------------------------------------------
def _pack_layer(key, cin, cout):
    w = 0.1 * jax.random.normal(key, (cout, cin), jnp.float32)
    gamma = jnp.ones((cout, 1), jnp.float32)   # BN affine defaults
    beta = jnp.zeros((cout, 1), jnp.float32)
    return jnp.concatenate([w, gamma, beta], axis=1)


def init_params(key, in_c):
    k1, k2, k3, k4 = jax.random.split(key, 4)
    # TransferConv_n parameters are not created (dead branch, see header).
    return {
        "h1": _pack_layer(k1, in_c, in_c),
        "h2": _pack_layer(k2, in_c, in_c),
        "m1": _pack_layer(k3, in_c // 2, in_c // 2),
        "m2": _pack_layer(k4, in_c // 2, in_c),
    }


# ----------------------------------------------------------------------------
# MFI forward
# ----------------------------------------------------------------------------
def mfi_forward(params, f_h, f_m, f_n):
    B, C, H, W = f_h.shape
    L = H * W
    Bm, Cm, Hm, Wm = f_m.shape
    assert Bm == B and Cm == C // 2, "TransferConv_m (resnet) expects in_c//2 channels"
    assert Hm % 2 == 0 and Wm % 2 == 0, "MaxPool2d(2) path requires even H, W"
    Hh, Wh = Hm // 2, Wm // 2
    assert Hh * Wh == L, "final .view(-1, c, h, w) requires pooled f_m spatial == h*w"

    # TransferConv_n is dead compute (its values are overwritten by
    # `f_n = f_h.view(...)` in the reference); only its (batch, channel)
    # shape matters for that .view to reproduce f_h exactly.
    assert f_n.shape[0] == B
    assert f_n.shape[1] == C // 4, "TransferConv_n (resnet) expects in_c//4 channels"
    assert f_n.shape[2] % 4 == 0 and f_n.shape[3] % 4 == 0
    assert 2 * (C // 2) == C

    # Lane-dense activation slabs (layout plumbing, tiny XLA re-layouts):
    #   x_h: (C, B*L) with lane index b*L + i*W + j
    #   x_m: (Cm, 4*B*L) with the 2x2-window corners as 4 contiguous lane
    #        segments of width B*L (exact: conv1x1/BN/LReLU are pointwise,
    #        so the corner split commutes with them and the in-kernel pool
    #        becomes three static-slice maxes).
    # TODO(synk): at production sizes, fold these re-layouts into the kernel
    # (strided DMA / in-kernel corner split) to avoid the extra HBM pass.
    x_h = jnp.transpose(f_h.reshape(B, C, L), (1, 0, 2)).reshape(C, B * L)
    x_m = jnp.transpose(f_m.reshape(B, Cm, Hh, 2, Wh, 2), (1, 3, 5, 0, 2, 4))
    x_m = x_m.reshape(Cm, 4 * B * L)

    out_shape = tuple(jax.ShapeDtypeStruct((B, C, L), jnp.float32) for _ in range(3))
    r_nm, r_mh, r_h = pl.pallas_call(
        _mfi_fused_kernel,
        out_shape=out_shape,
        grid=(1,),
        in_specs=[
            pl.BlockSpec((C, B * L), lambda i: (0, 0)),
            pl.BlockSpec((Cm, 4 * B * L), lambda i: (0, 0)),
            pl.BlockSpec(params["h1"].shape, lambda i: (0, 0)),
            pl.BlockSpec(params["h2"].shape, lambda i: (0, 0)),
            pl.BlockSpec(params["m1"].shape, lambda i: (0, 0)),
            pl.BlockSpec(params["m2"].shape, lambda i: (0, 0)),
        ],
        out_specs=(
            pl.BlockSpec((B, C, L), lambda i: (0, 0, 0)),
            pl.BlockSpec((B, C, L), lambda i: (0, 0, 0)),
            pl.BlockSpec((B, C, L), lambda i: (0, 0, 0)),
        ),
        compiler_params=pltpu.CompilerParams(vmem_limit_bytes=32 * 1024 * 1024),
    )(x_h, x_m, params["h1"], params["h2"], params["m1"], params["m2"])

    return (r_nm.reshape(B, C, H, W),
            r_mh.reshape(B, C, H, W),
            r_h.reshape(B, C, H, W))


if __name__ == "__main__":
    in_c = 8
    key = jax.random.PRNGKey(0)
    k_par, k_h, k_m, k_n = jax.random.split(key, 4)
    params = init_params(k_par, in_c)

    # hierarchy: f_h at base res, f_m at 2x res (half channels),
    # f_n at 4x res (quarter channels) — matches the resnet=True wiring.
    f_h = jax.random.normal(k_h, (2, in_c, 8, 8), jnp.float32)
    f_m = jax.random.normal(k_m, (2, in_c // 2, 16, 16), jnp.float32)
    f_n = jax.random.normal(k_n, (2, in_c // 4, 32, 32), jnp.float32)

    fwd = jax.jit(functools.partial(mfi_forward, params))
    outs = fwd(f_h, f_m, f_n)
    jax.block_until_ready(outs)

    assert all(o.shape == (2, in_c, 8, 8) for o in outs)
    assert all(o.dtype == jnp.float32 for o in outs)
    print("KERNEL_OK")
</pallas_src>

<mosaic_0001>
module attributes {stable_mosaic.version = 11 : i64} {
  func.func @_mfi_fused_kernel(%arg0: i32, %arg1: memref<8x128xf32, #tpu.memory_space<vmem>>, %arg2: memref<4x512xf32, #tpu.memory_space<vmem>>, %arg3: memref<8x10xf32, #tpu.memory_space<vmem>>, %arg4: memref<8x10xf32, #tpu.memory_space<vmem>>, %arg5: memref<4x6xf32, #tpu.memory_space<vmem>>, %arg6: memref<8x6xf32, #tpu.memory_space<vmem>>, %arg7: memref<2x8x64xf32, #tpu.memory_space<vmem>>, %arg8: memref<2x8x64xf32, #tpu.memory_space<vmem>>, %arg9: memref<2x8x64xf32, #tpu.memory_space<vmem>>) attributes {dimension_semantics = [#tpu.dimension_semantics<arbitrary>], iteration_bounds = array<i64: 1>, scalar_prefetch = 0 : i64, scratch_operands = 0 : i64, tpu.core_type = #tpu.core_type<tc>, window_params = [{pipeline_mode = #tpu.pipeline_mode<synchronous>, transform_indices = @transform_0, window_bounds = array<i64: 8, 128>}, {pipeline_mode = #tpu.pipeline_mode<synchronous>, transform_indices = @transform_1, window_bounds = array<i64: 4, 512>}, {pipeline_mode = #tpu.pipeline_mode<synchronous>, transform_indices = @transform_2, window_bounds = array<i64: 8, 10>}, {pipeline_mode = #tpu.pipeline_mode<synchronous>, transform_indices = @transform_3, window_bounds = array<i64: 8, 10>}, {pipeline_mode = #tpu.pipeline_mode<synchronous>, transform_indices = @transform_4, window_bounds = array<i64: 4, 6>}, {pipeline_mode = #tpu.pipeline_mode<synchronous>, transform_indices = @transform_5, window_bounds = array<i64: 8, 6>}, {pipeline_mode = #tpu.pipeline_mode<synchronous>, transform_indices = @transform_6, window_bounds = array<i64: 2, 8, 64>}, {pipeline_mode = #tpu.pipeline_mode<synchronous>, transform_indices = @transform_7, window_bounds = array<i64: 2, 8, 64>}, {pipeline_mode = #tpu.pipeline_mode<synchronous>, transform_indices = @transform_8, window_bounds = array<i64: 2, 8, 64>}]} {
    %c0 = arith.constant 0 : index
    %c0_0 = arith.constant 0 : index
    %0 = vector.load %arg1[%c0, %c0_0] : memref<8x128xf32, #tpu.memory_space<vmem>>, vector<8x128xf32>
    %c0_1 = arith.constant 0 : index
    %c0_2 = arith.constant 0 : index
    %1 = vector.load %arg3[%c0_1, %c0_2] : memref<8x10xf32, #tpu.memory_space<vmem>>, vector<8x8xf32>
    %c0_3 = arith.constant 0 : index
    %c8 = arith.constant 8 : index
    %2 = vector.load %arg3[%c0_3, %c8] : memref<8x10xf32, #tpu.memory_space<vmem>>, vector<8x1xf32>
    %c0_4 = arith.constant 0 : index
    %c9 = arith.constant 9 : index
    %3 = vector.load %arg3[%c0_4, %c9] : memref<8x10xf32, #tpu.memory_space<vmem>>, vector<8x1xf32>
    %cst = arith.constant dense<0.000000e+00> : vector<8x128xf32>
    %4 = tpu.matmul %1, %0, %cst {dimension_numbers = #tpu.dot_dimension_numbers<[1], [0], [0], [1], [0, 0, 1, 1], [], []>} : vector<8x8xf32>, vector<8x128xf32>, vector<8x128xf32> -> vector<8x128xf32>
    %cst_5 = arith.constant dense<0.000000e+00> : vector<8xf32>
    %5 = vector.multi_reduction <add>, %4, %cst_5 [1] : vector<8x128xf32> to vector<8xf32>
    %6 = vector.shape_cast %5 : vector<8xf32> to vector<8x1xf32>
    %cst_6 = arith.constant 7.812500e-03 : f32
    %7 = vector.broadcast %cst_6 : f32 to vector<8x1xf32>
    %8 = arith.mulf %6, %7 : vector<8x1xf32>
    %9 = arith.mulf %4, %4 : vector<8x128xf32>
    %cst_7 = arith.constant dense<0.000000e+00> : vector<8xf32>
    %10 = vector.multi_reduction <add>, %9, %cst_7 [1] : vector<8x128xf32> to vector<8xf32>
    %11 = vector.shape_cast %10 : vector<8xf32> to vector<8x1xf32>
    %cst_8 = arith.constant 7.812500e-03 : f32
    %12 = vector.broadcast %cst_8 : f32 to vector<8x1xf32>
    %13 = arith.mulf %11, %12 : vector<8x1xf32>
    %14 = arith.mulf %8, %8 : vector<8x1xf32>
    %15 = arith.subf %13, %14 : vector<8x1xf32>
    %cst_9 = arith.constant 0.000000e+00 : f32
    %16 = vector.broadcast %cst_9 : f32 to vector<8x1xf32>
    %17 = arith.maximumf %15, %16 : vector<8x1xf32>
    %18 = vector.broadcast %8 : vector<8x1xf32> to vector<8x128xf32>
    %19 = arith.subf %4, %18 : vector<8x128xf32>
    %cst_10 = arith.constant 9.99999974E-6 : f32
    %20 = vector.broadcast %cst_10 : f32 to vector<8x1xf32>
    %21 = arith.addf %17, %20 : vector<8x1xf32>
    %22 = math.rsqrt %21 : vector<8x1xf32>
    %23 = vector.broadcast %22 : vector<8x1xf32> to vector<8x128xf32>
    %24 = arith.mulf %19, %23 : vector<8x128xf32>
    %25 = vector.broadcast %2 : vector<8x1xf32> to vector<8x128xf32>
    %26 = arith.mulf %24, %25 : vector<8x128xf32>
    %27 = vector.broadcast %3 : vector<8x1xf32> to vector<8x128xf32>
    %28 = arith.addf %26, %27 : vector<8x128xf32>
    %cst_11 = arith.constant 0.000000e+00 : f32
    %29 = vector.broadcast %cst_11 : f32 to vector<8x128xf32>
    %30 = arith.cmpf oge, %28, %29 : vector<8x128xf32>
    %cst_12 = arith.constant 2.000000e-01 : f32
    %31 = vector.broadcast %cst_12 : f32 to vector<8x128xf32>
    %32 = arith.mulf %31, %28 : vector<8x128xf32>
    %33 = arith.select %30, %28, %32 : vector<8x128xi1>, vector<8x128xf32>
    %c0_13 = arith.constant 0 : index
    %c0_14 = arith.constant 0 : index
    %34 = vector.load %arg4[%c0_13, %c0_14] : memref<8x10xf32, #tpu.memory_space<vmem>>, vector<8x8xf32>
    %c0_15 = arith.constant 0 : index
    %c8_16 = arith.constant 8 : index
    %35 = vector.load %arg4[%c0_15, %c8_16] : memref<8x10xf32, #tpu.memory_space<vmem>>, vector<8x1xf32>
    %c0_17 = arith.constant 0 : index
    %c9_18 = arith.constant 9 : index
    %36 = vector.load %arg4[%c0_17, %c9_18] : memref<8x10xf32, #tpu.memory_space<vmem>>, vector<8x1xf32>
    %cst_19 = arith.constant dense<0.000000e+00> : vector<8x128xf32>
    %37 = tpu.matmul %34, %33, %cst_19 {dimension_numbers = #tpu.dot_dimension_numbers<[1], [0], [0], [1], [0, 0, 1, 1], [], []>} : vector<8x8xf32>, vector<8x128xf32>, vector<8x128xf32> -> vector<8x128xf32>
    %cst_20 = arith.constant dense<0.000000e+00> : vector<8xf32>
    %38 = vector.multi_reduction <add>, %37, %cst_20 [1] : vector<8x128xf32> to vector<8xf32>
    %39 = vector.shape_cast %38 : vector<8xf32> to vector<8x1xf32>
    %cst_21 = arith.constant 7.812500e-03 : f32
    %40 = vector.broadcast %cst_21 : f32 to vector<8x1xf32>
    %41 = arith.mulf %39, %40 : vector<8x1xf32>
    %42 = arith.mulf %37, %37 : vector<8x128xf32>
    %cst_22 = arith.constant dense<0.000000e+00> : vector<8xf32>
    %43 = vector.multi_reduction <add>, %42, %cst_22 [1] : vector<8x128xf32> to vector<8xf32>
    %44 = vector.shape_cast %43 : vector<8xf32> to vector<8x1xf32>
    %cst_23 = arith.constant 7.812500e-03 : f32
    %45 = vector.broadcast %cst_23 : f32 to vector<8x1xf32>
    %46 = arith.mulf %44, %45 : vector<8x1xf32>
    %47 = arith.mulf %41, %41 : vector<8x1xf32>
    %48 = arith.subf %46, %47 : vector<8x1xf32>
    %cst_24 = arith.constant 0.000000e+00 : f32
    %49 = vector.broadcast %cst_24 : f32 to vector<8x1xf32>
    %50 = arith.maximumf %48, %49 : vector<8x1xf32>
    %51 = vector.broadcast %41 : vector<8x1xf32> to vector<8x128xf32>
    %52 = arith.subf %37, %51 : vector<8x128xf32>
    %cst_25 = arith.constant 9.99999974E-6 : f32
    %53 = vector.broadcast %cst_25 : f32 to vector<8x1xf32>
    %54 = arith.addf %50, %53 : vector<8x1xf32>
    %55 = math.rsqrt %54 : vector<8x1xf32>
    %56 = vector.broadcast %55 : vector<8x1xf32> to vector<8x128xf32>
    %57 = arith.mulf %52, %56 : vector<8x128xf32>
    %58 = vector.broadcast %35 : vector<8x1xf32> to vector<8x128xf32>
    %59 = arith.mulf %57, %58 : vector<8x128xf32>
    %60 = vector.broadcast %36 : vector<8x1xf32> to vector<8x128xf32>
    %61 = arith.addf %59, %60 : vector<8x128xf32>
    %cst_26 = arith.constant 0.000000e+00 : f32
    %62 = vector.broadcast %cst_26 : f32 to vector<8x128xf32>
    %63 = arith.cmpf oge, %61, %62 : vector<8x128xf32>
    %cst_27 = arith.constant 2.000000e-01 : f32
    %64 = vector.broadcast %cst_27 : f32 to vector<8x128xf32>
    %65 = arith.mulf %64, %61 : vector<8x128xf32>
    %66 = arith.select %63, %61, %65 : vector<8x128xi1>, vector<8x128xf32>
    %c0_28 = arith.constant 0 : index
    %c0_29 = arith.constant 0 : index
    %67 = vector.load %arg2[%c0_28, %c0_29] : memref<4x512xf32, #tpu.memory_space<vmem>>, vector<4x512xf32>
    %c0_30 = arith.constant 0 : index
    %c0_31 = arith.constant 0 : index
    %68 = vector.load %arg5[%c0_30, %c0_31] : memref<4x6xf32, #tpu.memory_space<vmem>>, vector<4x4xf32>
    %c0_32 = arith.constant 0 : index
    %c4 = arith.constant 4 : index
    %69 = vector.load %arg5[%c0_32, %c4] : memref<4x6xf32, #tpu.memory_space<vmem>>, vector<4x1xf32>
    %c0_33 = arith.constant 0 : index
    %c5 = arith.constant 5 : index
    %70 = vector.load %arg5[%c0_33, %c5] : memref<4x6xf32, #tpu.memory_space<vmem>>, vector<4x1xf32>
    %cst_34 = arith.constant dense<0.000000e+00> : vector<4x512xf32>
    %71 = tpu.matmul %68, %67, %cst_34 {dimension_numbers = #tpu.dot_dimension_numbers<[1], [0], [0], [1], [0, 0, 1, 1], [], []>} : vector<4x4xf32>, vector<4x512xf32>, vector<4x512xf32> -> vector<4x512xf32>
    %cst_35 = arith.constant dense<0.000000e+00> : vector<4xf32>
    %72 = vector.multi_reduction <add>, %71, %cst_35 [1] : vector<4x512xf32> to vector<4xf32>
    %73 = vector.shape_cast %72 : vector<4xf32> to vector<4x1xf32>
    %cst_36 = arith.constant 0.001953125 : f32
    %74 = vector.broadcast %cst_36 : f32 to vector<4x1xf32>
    %75 = arith.mulf %73, %74 : vector<4x1xf32>
    %76 = arith.mulf %71, %71 : vector<4x512xf32>
    %cst_37 = arith.constant dense<0.000000e+00> : vector<4xf32>
    %77 = vector.multi_reduction <add>, %76, %cst_37 [1] : vector<4x512xf32> to vector<4xf32>
    %78 = vector.shape_cast %77 : vector<4xf32> to vector<4x1xf32>
    %cst_38 = arith.constant 0.001953125 : f32
    %79 = vector.broadcast %cst_38 : f32 to vector<4x1xf32>
    %80 = arith.mulf %78, %79 : vector<4x1xf32>
    %81 = arith.mulf %75, %75 : vector<4x1xf32>
    %82 = arith.subf %80, %81 : vector<4x1xf32>
    %cst_39 = arith.constant 0.000000e+00 : f32
    %83 = vector.broadcast %cst_39 : f32 to vector<4x1xf32>
    %84 = arith.maximumf %82, %83 : vector<4x1xf32>
    %85 = vector.broadcast %75 : vector<4x1xf32> to vector<4x512xf32>
    %86 = arith.subf %71, %85 : vector<4x512xf32>
    %cst_40 = arith.constant 9.99999974E-6 : f32
    %87 = vector.broadcast %cst_40 : f32 to vector<4x1xf32>
    %88 = arith.addf %84, %87 : vector<4x1xf32>
    %89 = math.rsqrt %88 : vector<4x1xf32>
    %90 = vector.broadcast %89 : vector<4x1xf32> to vector<4x512xf32>
    %91 = arith.mulf %86, %90 : vector<4x512xf32>
    %92 = vector.broadcast %69 : vector<4x1xf32> to vector<4x512xf32>
    %93 = arith.mulf %91, %92 : vector<4x512xf32>
    %94 = vector.broadcast %70 : vector<4x1xf32> to vector<4x512xf32>
    %95 = arith.addf %93, %94 : vector<4x512xf32>
    %cst_41 = arith.constant 0.000000e+00 : f32
    %96 = vector.broadcast %cst_41 : f32 to vector<4x512xf32>
    %97 = arith.cmpf oge, %95, %96 : vector<4x512xf32>
    %cst_42 = arith.constant 2.000000e-01 : f32
    %98 = vector.broadcast %cst_42 : f32 to vector<4x512xf32>
    %99 = arith.mulf %98, %95 : vector<4x512xf32>
    %100 = arith.select %97, %95, %99 : vector<4x512xi1>, vector<4x512xf32>
    %c0_43 = arith.constant 0 : index
    %c0_44 = arith.constant 0 : index
    %101 = vector.load %arg6[%c0_43, %c0_44] : memref<8x6xf32, #tpu.memory_space<vmem>>, vector<8x4xf32>
    %c0_45 = arith.constant 0 : index
    %c4_46 = arith.constant 4 : index
    %102 = vector.load %arg6[%c0_45, %c4_46] : memref<8x6xf32, #tpu.memory_space<vmem>>, vector<8x1xf32>
    %c0_47 = arith.constant 0 : index
    %c5_48 = arith.constant 5 : index
    %103 = vector.load %arg6[%c0_47, %c5_48] : memref<8x6xf32, #tpu.memory_space<vmem>>, vector<8x1xf32>
    %cst_49 = arith.constant dense<0.000000e+00> : vector<8x512xf32>
    %104 = tpu.matmul %101, %100, %cst_49 {dimension_numbers = #tpu.dot_dimension_numbers<[1], [0], [0], [1], [0, 0, 1, 1], [], []>} : vector<8x4xf32>, vector<4x512xf32>, vector<8x512xf32> -> vector<8x512xf32>
    %cst_50 = arith.constant dense<0.000000e+00> : vector<8xf32>
    %105 = vector.multi_reduction <add>, %104, %cst_50 [1] : vector<8x512xf32> to vector<8xf32>
    %106 = vector.shape_cast %105 : vector<8xf32> to vector<8x1xf32>
    %cst_51 = arith.constant 0.001953125 : f32
    %107 = vector.broadcast %cst_51 : f32 to vector<8x1xf32>
    %108 = arith.mulf %106, %107 : vector<8x1xf32>
    %109 = arith.mulf %104, %104 : vector<8x512xf32>
    %cst_52 = arith.constant dense<0.000000e+00> : vector<8xf32>
    %110 = vector.multi_reduction <add>, %109, %cst_52 [1] : vector<8x512xf32> to vector<8xf32>
    %111 = vector.shape_cast %110 : vector<8xf32> to vector<8x1xf32>
    %cst_53 = arith.constant 0.001953125 : f32
    %112 = vector.broadcast %cst_53 : f32 to vector<8x1xf32>
    %113 = arith.mulf %111, %112 : vector<8x1xf32>
    %114 = arith.mulf %108, %108 : vector<8x1xf32>
    %115 = arith.subf %113, %114 : vector<8x1xf32>
    %cst_54 = arith.constant 0.000000e+00 : f32
    %116 = vector.broadcast %cst_54 : f32 to vector<8x1xf32>
    %117 = arith.maximumf %115, %116 : vector<8x1xf32>
    %118 = vector.broadcast %108 : vector<8x1xf32> to vector<8x512xf32>
    %119 = arith.subf %104, %118 : vector<8x512xf32>
    %cst_55 = arith.constant 9.99999974E-6 : f32
    %120 = vector.broadcast %cst_55 : f32 to vector<8x1xf32>
    %121 = arith.addf %117, %120 : vector<8x1xf32>
    %122 = math.rsqrt %121 : vector<8x1xf32>
    %123 = vector.broadcast %122 : vector<8x1xf32> to vector<8x512xf32>
    %124 = arith.mulf %119, %123 : vector<8x512xf32>
    %125 = vector.broadcast %102 : vector<8x1xf32> to vector<8x512xf32>
    %126 = arith.mulf %124, %125 : vector<8x512xf32>
    %127 = vector.broadcast %103 : vector<8x1xf32> to vector<8x512xf32>
    %128 = arith.addf %126, %127 : vector<8x512xf32>
    %cst_56 = arith.constant 0.000000e+00 : f32
    %129 = vector.broadcast %cst_56 : f32 to vector<8x512xf32>
    %130 = arith.cmpf oge, %128, %129 : vector<8x512xf32>
    %cst_57 = arith.constant 2.000000e-01 : f32
    %131 = vector.broadcast %cst_57 : f32 to vector<8x512xf32>
    %132 = arith.mulf %131, %128 : vector<8x512xf32>
    %133 = arith.select %130, %128, %132 : vector<8x512xi1>, vector<8x512xf32>
    %134 = vector.extract_strided_slice %133 {offsets = [0, 0], sizes = [8, 128], strides = [1, 1]} : vector<8x512xf32> to vector<8x128xf32>
    %135 = vector.extract_strided_slice %133 {offsets = [0, 128], sizes = [8, 128], strides = [1, 1]} : vector<8x512xf32> to vector<8x128xf32>
    %136 = arith.maximumf %134, %135 : vector<8x128xf32>
    %137 = vector.extract_strided_slice %133 {offsets = [0, 256], sizes = [8, 128], strides = [1, 1]} : vector<8x512xf32> to vector<8x128xf32>
    %138 = vector.extract_strided_slice %133 {offsets = [0, 384], sizes = [8, 128], strides = [1, 1]} : vector<8x512xf32> to vector<8x128xf32>
    %139 = arith.maximumf %137, %138 : vector<8x128xf32>
    %140 = arith.maximumf %136, %139 : vector<8x128xf32>
    %141 = vector.extract_strided_slice %66 {offsets = [0, 0], sizes = [8, 64], strides = [1, 1]} : vector<8x128xf32> to vector<8x64xf32>
    %142 = vector.extract_strided_slice %66 {offsets = [0, 64], sizes = [8, 64], strides = [1, 1]} : vector<8x128xf32> to vector<8x64xf32>
    %143 = vector.extract_strided_slice %140 {offsets = [0, 0], sizes = [8, 64], strides = [1, 1]} : vector<8x128xf32> to vector<8x64xf32>
    %144 = vector.extract_strided_slice %140 {offsets = [0, 64], sizes = [8, 64], strides = [1, 1]} : vector<8x128xf32> to vector<8x64xf32>
    %cst_58 = arith.constant dense<0.000000e+00> : vector<64x64xf32>
    %145 = tpu.matmul %141, %143, %cst_58 {dimension_numbers = #tpu.dot_dimension_numbers<[0], [0], [1], [1], [0, 1, 1, 1], [], []>} : vector<8x64xf32>, vector<8x64xf32>, vector<64x64xf32> -> vector<64x64xf32>
    %cst_59 = arith.constant dense<0.000000e+00> : vector<64x64xf32>
    %146 = tpu.matmul %142, %144, %cst_59 {dimension_numbers = #tpu.dot_dimension_numbers<[0], [0], [1], [1], [0, 1, 1, 1], [], []>} : vector<8x64xf32>, vector<8x64xf32>, vector<64x64xf32> -> vector<64x64xf32>
    %147 = arith.mulf %145, %145 : vector<64x64xf32>
    %cst_60 = arith.constant dense<0.000000e+00> : vector<64xf32>
    %148 = vector.multi_reduction <add>, %147, %cst_60 [1] : vector<64x64xf32> to vector<64xf32>
    %149 = vector.shape_cast %148 : vector<64xf32> to vector<64x1xf32>
    %cst_61 = arith.constant dense<0.000000e+00> : vector<1xf32>
    %150 = vector.multi_reduction <add>, %149, %cst_61 [0] : vector<64x1xf32> to vector<1xf32>
    %151 = vector.shape_cast %150 : vector<1xf32> to vector<1x1xf32>
    %152 = arith.mulf %146, %146 : vector<64x64xf32>
    %cst_62 = arith.constant dense<0.000000e+00> : vector<64xf32>
    %153 = vector.multi_reduction <add>, %152, %cst_62 [1] : vector<64x64xf32> to vector<64xf32>
    %154 = vector.shape_cast %153 : vector<64xf32> to vector<64x1xf32>
    %cst_63 = arith.constant dense<0.000000e+00> : vector<1xf32>
    %155 = vector.multi_reduction <add>, %154, %cst_63 [0] : vector<64x1xf32> to vector<1xf32>
    %156 = vector.shape_cast %155 : vector<1xf32> to vector<1x1xf32>
    %157 = arith.addf %151, %156 : vector<1x1xf32>
    %158 = math.rsqrt %157 : vector<1x1xf32>
    %159 = vector.broadcast %158 : vector<1x1xf32> to vector<64x64xf32>
    %160 = arith.mulf %145, %159 : vector<64x64xf32>
    %161 = math.tanh %160 : vector<64x64xf32>
    %cst_64 = arith.constant dense<0.000000e+00> : vector<8x64xf32>
    %162 = tpu.matmul %141, %161, %cst_64 {dimension_numbers = #tpu.dot_dimension_numbers<[1], [0], [0], [1], [0, 0, 1, 1], [], []>} : vector<8x64xf32>, vector<64x64xf32>, vector<8x64xf32> -> vector<8x64xf32>
    %163 = arith.addf %162, %143 : vector<8x64xf32>
    %164 = vector.broadcast %158 : vector<1x1xf32> to vector<64x64xf32>
    %165 = arith.mulf %146, %164 : vector<64x64xf32>
    %166 = math.tanh %165 : vector<64x64xf32>
    %cst_65 = arith.constant dense<0.000000e+00> : vector<8x64xf32>
    %167 = tpu.matmul %142, %166, %cst_65 {dimension_numbers = #tpu.dot_dimension_numbers<[1], [0], [0], [1], [0, 0, 1, 1], [], []>} : vector<8x64xf32>, vector<64x64xf32>, vector<8x64xf32> -> vector<8x64xf32>
    %168 = arith.addf %167, %144 : vector<8x64xf32>
    %cst_66 = arith.constant dense<0.000000e+00> : vector<64x64xf32>
    %169 = tpu.matmul %163, %141, %cst_66 {dimension_numbers = #tpu.dot_dimension_numbers<[0], [0], [1], [1], [0, 1, 1, 1], [], []>} : vector<8x64xf32>, vector<8x64xf32>, vector<64x64xf32> -> vector<64x64xf32>
    %cst_67 = arith.constant dense<0.000000e+00> : vector<64x64xf32>
    %170 = tpu.matmul %168, %142, %cst_67 {dimension_numbers = #tpu.dot_dimension_numbers<[0], [0], [1], [1], [0, 1, 1, 1], [], []>} : vector<8x64xf32>, vector<8x64xf32>, vector<64x64xf32> -> vector<64x64xf32>
    %171 = arith.mulf %169, %169 : vector<64x64xf32>
    %cst_68 = arith.constant dense<0.000000e+00> : vector<64xf32>
    %172 = vector.multi_reduction <add>, %171, %cst_68 [1] : vector<64x64xf32> to vector<64xf32>
    %173 = vector.shape_cast %172 : vector<64xf32> to vector<64x1xf32>
    %cst_69 = arith.constant dense<0.000000e+00> : vector<1xf32>
    %174 = vector.multi_reduction <add>, %173, %cst_69 [0] : vector<64x1xf32> to vector<1xf32>
    %175 = vector.shape_cast %174 : vector<1xf32> to vector<1x1xf32>
    %176 = arith.mulf %170, %170 : vector<64x64xf32>
    %cst_70 = arith.constant dense<0.000000e+00> : vector<64xf32>
    %177 = vector.multi_reduction <add>, %176, %cst_70 [1] : vector<64x64xf32> to vector<64xf32>
    %178 = vector.shape_cast %177 : vector<64xf32> to vector<64x1xf32>
    %cst_71 = arith.constant dense<0.000000e+00> : vector<1xf32>
    %179 = vector.multi_reduction <add>, %178, %cst_71 [0] : vector<64x1xf32> to vector<1xf32>
    %180 = vector.shape_cast %179 : vector<1xf32> to vector<1x1xf32>
    %181 = arith.addf %175, %180 : vector<1x1xf32>
    %182 = math.rsqrt %181 : vector<1x1xf32>
    %183 = vector.broadcast %182 : vector<1x1xf32> to vector<64x64xf32>
    %184 = arith.mulf %169, %183 : vector<64x64xf32>
    %185 = math.tanh %184 : vector<64x64xf32>
    %cst_72 = arith.constant dense<0.000000e+00> : vector<8x64xf32>
    %186 = tpu.matmul %163, %185, %cst_72 {dimension_numbers = #tpu.dot_dimension_numbers<[1], [0], [0], [1], [0, 0, 1, 1], [], []>} : vector<8x64xf32>, vector<64x64xf32>, vector<8x64xf32> -> vector<8x64xf32>
    %187 = arith.addf %186, %141 : vector<8x64xf32>
    %188 = vector.broadcast %182 : vector<1x1xf32> to vector<64x64xf32>
    %189 = arith.mulf %170, %188 : vector<64x64xf32>
    %190 = math.tanh %189 : vector<64x64xf32>
    %cst_73 = arith.constant dense<0.000000e+00> : vector<8x64xf32>
    %191 = tpu.matmul %168, %190, %cst_73 {dimension_numbers = #tpu.dot_dimension_numbers<[1], [0], [0], [1], [0, 0, 1, 1], [], []>} : vector<8x64xf32>, vector<64x64xf32>, vector<8x64xf32> -> vector<8x64xf32>
    %192 = arith.addf %191, %142 : vector<8x64xf32>
    %cst_74 = arith.constant dense<0.000000e+00> : vector<64x64xf32>
    %193 = tpu.matmul %187, %141, %cst_74 {dimension_numbers = #tpu.dot_dimension_numbers<[0], [0], [1], [1], [0, 1, 1, 1], [], []>} : vector<8x64xf32>, vector<8x64xf32>, vector<64x64xf32> -> vector<64x64xf32>
    %cst_75 = arith.constant dense<0.000000e+00> : vector<64x64xf32>
    %194 = tpu.matmul %192, %142, %cst_75 {dimension_numbers = #tpu.dot_dimension_numbers<[0], [0], [1], [1], [0, 1, 1, 1], [], []>} : vector<8x64xf32>, vector<8x64xf32>, vector<64x64xf32> -> vector<64x64xf32>
    %195 = arith.mulf %193, %193 : vector<64x64xf32>
    %cst_76 = arith.constant dense<0.000000e+00> : vector<64xf32>
    %196 = vector.multi_reduction <add>, %195, %cst_76 [1] : vector<64x64xf32> to vector<64xf32>
    %197 = vector.shape_cast %196 : vector<64xf32> to vector<64x1xf32>
    %cst_77 = arith.constant dense<0.000000e+00> : vector<1xf32>
    %198 = vector.multi_reduction <add>, %197, %cst_77 [0] : vector<64x1xf32> to vector<1xf32>
    %199 = vector.shape_cast %198 : vector<1xf32> to vector<1x1xf32>
    %200 = arith.mulf %194, %194 : vector<64x64xf32>
    %cst_78 = arith.constant dense<0.000000e+00> : vector<64xf32>
    %201 = vector.multi_reduction <add>, %200, %cst_78 [1] : vector<64x64xf32> to vector<64xf32>
    %202 = vector.shape_cast %201 : vector<64xf32> to vector<64x1xf32>
    %cst_79 = arith.constant dense<0.000000e+00> : vector<1xf32>
    %203 = vector.multi_reduction <add>, %202, %cst_79 [0] : vector<64x1xf32> to vector<1xf32>
    %204 = vector.shape_cast %203 : vector<1xf32> to vector<1x1xf32>
    %205 = arith.addf %199, %204 : vector<1x1xf32>
    %206 = math.rsqrt %205 : vector<1x1xf32>
    %207 = vector.broadcast %206 : vector<1x1xf32> to vector<64x64xf32>
    %208 = arith.mulf %193, %207 : vector<64x64xf32>
    %209 = math.tanh %208 : vector<64x64xf32>
    %cst_80 = arith.constant dense<0.000000e+00> : vector<8x64xf32>
    %210 = tpu.matmul %187, %209, %cst_80 {dimension_numbers = #tpu.dot_dimension_numbers<[1], [0], [0], [1], [0, 0, 1, 1], [], []>} : vector<8x64xf32>, vector<64x64xf32>, vector<8x64xf32> -> vector<8x64xf32>
    %211 = arith.addf %210, %141 : vector<8x64xf32>
    %212 = vector.broadcast %206 : vector<1x1xf32> to vector<64x64xf32>
    %213 = arith.mulf %194, %212 : vector<64x64xf32>
    %214 = math.tanh %213 : vector<64x64xf32>
    %cst_81 = arith.constant dense<0.000000e+00> : vector<8x64xf32>
    %215 = tpu.matmul %192, %214, %cst_81 {dimension_numbers = #tpu.dot_dimension_numbers<[1], [0], [0], [1], [0, 0, 1, 1], [], []>} : vector<8x64xf32>, vector<64x64xf32>, vector<8x64xf32> -> vector<8x64xf32>
    %216 = arith.addf %215, %142 : vector<8x64xf32>
    %c0_82 = arith.constant 0 : index
    %c0_83 = arith.constant 0 : index
    %c0_84 = arith.constant 0 : index
    %217 = vector.load %arg7[%c0_82, %c0_83, %c0_84] : memref<2x8x64xf32, #tpu.memory_space<vmem>>, vector<1x8x64xf32>
    %218 = vector.shape_cast %217 : vector<1x8x64xf32> to vector<8x64xf32>
    %219 = vector.shape_cast %163 : vector<8x64xf32> to vector<1x8x64xf32>
    tpu.vector_store %arg7[%c0_82, %c0_83, %c0_84], %219 {strides = array<i32>} : memref<2x8x64xf32, #tpu.memory_space<vmem>>, vector<1x8x64xf32>,
    %c0_85 = arith.constant 0 : index
    %c0_86 = arith.constant 0 : index
    %c0_87 = arith.constant 0 : index
    %220 = vector.load %arg8[%c0_85, %c0_86, %c0_87] : memref<2x8x64xf32, #tpu.memory_space<vmem>>, vector<1x8x64xf32>
    %221 = vector.shape_cast %220 : vector<1x8x64xf32> to vector<8x64xf32>
    %222 = vector.shape_cast %187 : vector<8x64xf32> to vector<1x8x64xf32>
    tpu.vector_store %arg8[%c0_85, %c0_86, %c0_87], %222 {strides = array<i32>} : memref<2x8x64xf32, #tpu.memory_space<vmem>>, vector<1x8x64xf32>,
    %c0_88 = arith.constant 0 : index
    %c0_89 = arith.constant 0 : index
    %c0_90 = arith.constant 0 : index
    %223 = vector.load %arg9[%c0_88, %c0_89, %c0_90] : memref<2x8x64xf32, #tpu.memory_space<vmem>>, vector<1x8x64xf32>
    %224 = vector.shape_cast %223 : vector<1x8x64xf32> to vector<8x64xf32>
    %225 = vector.shape_cast %211 : vector<8x64xf32> to vector<1x8x64xf32>
    tpu.vector_store %arg9[%c0_88, %c0_89, %c0_90], %225 {strides = array<i32>} : memref<2x8x64xf32, #tpu.memory_space<vmem>>, vector<1x8x64xf32>,
    %c1 = arith.constant 1 : index
    %c0_91 = arith.constant 0 : index
    %c0_92 = arith.constant 0 : index
    %226 = vector.load %arg7[%c1, %c0_91, %c0_92] : memref<2x8x64xf32, #tpu.memory_space<vmem>>, vector<1x8x64xf32>
    %227 = vector.shape_cast %226 : vector<1x8x64xf32> to vector<8x64xf32>
    %228 = vector.shape_cast %168 : vector<8x64xf32> to vector<1x8x64xf32>
    tpu.vector_store %arg7[%c1, %c0_91, %c0_92], %228 {strides = array<i32>} : memref<2x8x64xf32, #tpu.memory_space<vmem>>, vector<1x8x64xf32>,
    %c1_93 = arith.constant 1 : index
    %c0_94 = arith.constant 0 : index
    %c0_95 = arith.constant 0 : index
    %229 = vector.load %arg8[%c1_93, %c0_94, %c0_95] : memref<2x8x64xf32, #tpu.memory_space<vmem>>, vector<1x8x64xf32>
    %230 = vector.shape_cast %229 : vector<1x8x64xf32> to vector<8x64xf32>
    %231 = vector.shape_cast %192 : vector<8x64xf32> to vector<1x8x64xf32>
    tpu.vector_store %arg8[%c1_93, %c0_94, %c0_95], %231 {strides = array<i32>} : memref<2x8x64xf32, #tpu.memory_space<vmem>>, vector<1x8x64xf32>,
    %c1_96 = arith.constant 1 : index
    %c0_97 = arith.constant 0 : index
    %c0_98 = arith.constant 0 : index
    %232 = vector.load %arg9[%c1_96, %c0_97, %c0_98] : memref<2x8x64xf32, #tpu.memory_space<vmem>>, vector<1x8x64xf32>
    %233 = vector.shape_cast %232 : vector<1x8x64xf32> to vector<8x64xf32>
    %234 = vector.shape_cast %216 : vector<8x64xf32> to vector<1x8x64xf32>
    tpu.vector_store %arg9[%c1_96, %c0_97, %c0_98], %234 {strides = array<i32>} : memref<2x8x64xf32, #tpu.memory_space<vmem>>, vector<1x8x64xf32>,
    return
  }
  func.func @transform_0(%arg0: i32) -> (i32, i32) {
    %c0_i32 = arith.constant 0 : i32
    %c0_i32_0 = arith.constant 0 : i32
    %c0_i32_1 = arith.constant 0 : i32
    return %c0_i32, %c0_i32_0 : i32, i32
  }
  func.func @transform_1(%arg0: i32) -> (i32, i32) {
    %c0_i32 = arith.constant 0 : i32
    %c0_i32_0 = arith.constant 0 : i32
    %c0_i32_1 = arith.constant 0 : i32
    return %c0_i32, %c0_i32_0 : i32, i32
  }
  func.func @transform_2(%arg0: i32) -> (i32, i32) {
    %c0_i32 = arith.constant 0 : i32
    %c0_i32_0 = arith.constant 0 : i32
    %c0_i32_1 = arith.constant 0 : i32
    return %c0_i32, %c0_i32_0 : i32, i32
  }
  func.func @transform_3(%arg0: i32) -> (i32, i32) {
    %c0_i32 = arith.constant 0 : i32
    %c0_i32_0 = arith.constant 0 : i32
    %c0_i32_1 = arith.constant 0 : i32
    return %c0_i32, %c0_i32_0 : i32, i32
  }
  func.func @transform_4(%arg0: i32) -> (i32, i32) {
    %c0_i32 = arith.constant 0 : i32
    %c0_i32_0 = arith.constant 0 : i32
    %c0_i32_1 = arith.constant 0 : i32
    return %c0_i32, %c0_i32_0 : i32, i32
  }
  func.func @transform_5(%arg0: i32) -> (i32, i32) {
    %c0_i32 = arith.constant 0 : i32
    %c0_i32_0 = arith.constant 0 : i32
    %c0_i32_1 = arith.constant 0 : i32
    return %c0_i32, %c0_i32_0 : i32, i32
  }
  func.func @transform_6(%arg0: i32) -> (i32, i32, i32) {
    %c0_i32 = arith.constant 0 : i32
    %c0_i32_0 = arith.constant 0 : i32
    %c0_i32_1 = arith.constant 0 : i32
    %c0_i32_2 = arith.constant 0 : i32
    return %c0_i32, %c0_i32_0, %c0_i32_1 : i32, i32, i32
  }
  func.func @transform_7(%arg0: i32) -> (i32, i32, i32) {
    %c0_i32 = arith.constant 0 : i32
    %c0_i32_0 = arith.constant 0 : i32
    %c0_i32_1 = arith.constant 0 : i32
    %c0_i32_2 = arith.constant 0 : i32
    return %c0_i32, %c0_i32_0, %c0_i32_1 : i32, i32, i32
  }
  func.func @transform_8(%arg0: i32) -> (i32, i32, i32) {
    %c0_i32 = arith.constant 0 : i32
    %c0_i32_0 = arith.constant 0 : i32
    %c0_i32_1 = arith.constant 0 : i32
    %c0_i32_2 = arith.constant 0 : i32
    return %c0_i32, %c0_i32_0, %c0_i32_1 : i32, i32, i32
  }
}

</mosaic_0001>

<bundles_post_ra>
// kernel: mfi_forward.1
= control target key start
LH: loop header
LB: loop body
LE: loop exit
PB: predicated region body
PF: predicated region fallthrough
CT: control target
= control target key end

     0   :  { %vm28_vm0 = vcmask 64512   ;;  %v1840_v2 = vmov 8   ;;  %v1841_v3 = vmov 9   ;;  %vm164_vm1 = vcmask 1043456   ;;  %s2375_s0 = inlined_call_operand.vmem [shape: f32[8,128], index: 0, kind: input, shape index: {}]   ;;  %s2376_s2 = inlined_call_operand.vmem [shape: f32[8,10], index: 2, kind: input, shape index: {}]   ;;  %s2377_s1 = inlined_call_operand.vmem [shape: f32[4,512], index: 1, kind: input, shape index: {}]   ;;  %s2378_s4 = inlined_call_operand.vmem [shape: f32[4,6], index: 4, kind: input, shape index: {}]   ;;  %s2379_s3 = inlined_call_operand.vmem [shape: f32[8,10], index: 3, kind: input, shape index: {}]   ;;  %s2380_s5 = inlined_call_operand.vmem [shape: f32[8,6], index: 5, kind: input, shape index: {}]   ;;  %s2381_s6 = inlined_call_operand.vmem [shape: f32[2,8,64], index: 6, kind: output, shape index: {0}]   ;;  %s2382_s7 = inlined_call_operand.vmem [shape: f32[2,8,64], index: 7, kind: output, shape index: {1}]   ;;  %s2383_s8 = inlined_call_operand.vmem [shape: f32[2,8,64], index: 8, kind: output, shape index: {2}]  }
   0x1   :  { %v26_v0 = vld [vmem:[%s2375_s0] sm:$0xff]  ;;  %1722 = vset.pattern.permute.xlu1 %v1840_v2  ;;  %1726 = vset.pattern.permute.xlu2 %v1840_v2  ;;  %v149_v8 = vld [vmem:[%s2377_s1 + $0x8] sm:$0xff]  ;;  %vm160_vm2 = vcmask 31744   ;;  %v1842_v20 = vmov 5   ;;  %v1843_v39 = vmov 4  }
   0x2   :  { %v27_v1 = vld [vmem:[%s2376_s2] sm:$0xff]  ;;  %47 = vmatpush.msra.mxu0 %v26_v0  ;;  %155 = vst [vmem:[#allocation1 + $0x10] ss:$2 sm:$0xff] %v149_v8  ;;  %1724 = vset.pattern.permute.xlu0 %v1843_v39 }
   0x3   :  { %1639 = vmatmul.msk.f32.vlgmr.msra.gmra.mxu0 %vm28_vm0, %v27_v1  ;;  %76 = vperm.xlu1 %1722, %v27_v1   ;;  %v148_v6 = vld [vmem:[%s2377_s1] sm:$0xff] }
   0x4   :  { %153 = vst [vmem:[#allocation1] ss:$2 sm:$0xff] %v148_v6  ;;  %v150_v12 = vld [vmem:[%s2378_s4] sm:$0xf] }
   0x5   :  { %v88_v35 = vld [vmem:[%s2379_s3] sm:$0xff] }
   0x6   :  { %v1951_v63 = vld [vmem:[%s2380_s5] sm:$0xff]  ;;  %s1844_s5 = smov 64  }
   0x9   :  { %v158_v17 = vld.sshfl [vmem:[#allocation1 + $0x10] sm:$0xff pattern:$0x75316420]  ;;  %v159_v37 = vld.sshfl [vmem:[#allocation1 + $0x18] sm:$0xff pattern:$0x75316420] }
   0xb   :  { %1723 = vset.pattern.permute.xlu1 %v1841_v3  ;;  %v156_v9 = vld.sshfl [vmem:[#allocation1] sm:$0xff pattern:$0x75316420]  ;;  %v157_v10 = vld.sshfl [vmem:[#allocation1 + $0x8] sm:$0xff pattern:$0x75316420] }
   0xc   :  { %81 = vperm.xlu1 %1723, %v27_v1   ;;  %1641 = vmatpush.msk.msrb.mxu0 %vm164_vm1, %v156_v9 }
   0xd   :  { %1643 = vmatpush.msk.msra.mxu3 %vm164_vm1, %v157_v10  ;;  %1642 = vmatmul.msk.f32.vlgmr.msrb.gmra.mxu0 %vm160_vm2, %v150_v12 }
   0xe   :  { %1644 = vmatmul.msk.f32.vlgmr.msra.gmra.mxu3 %vm160_vm2, %v150_v12  ;;  %1645 = vmatpush.msk.msra.mxu0 %vm164_vm1, %v158_v17 }
  0x14   :  { %1725 = vset.pattern.permute.xlu1 %v1842_v20 }
  0x15   :  { %1646 = vmatmul.msk.f32.vlgmr.msra.gmra.mxu0 %vm160_vm2, %v150_v12  ;;  %308 = vperm.xlu1 %1725, %v150_v12  }
  0x75   :  { %v77_v24 = vpop.permute.xlu1 %76 }
  0x7e   :  { %v82_v31 = vpop.permute.xlu1 %81 }
  0x80   :  { %v49_v4 = vpop.f32.mrf.mxu0 }
  0x81   :  { %52 = vadd.xlane.f32.xlu0 %v49_v4  ;;  %v55_v5 = vmul.f32 %v49_v4, %v49_v4 }
  0x87   :  { %v309_v2 = vpop.permute.xlu1 %308 }
  0x89   :  { %56 = vadd.xlane.f32.xlu0 %v55_v5 }
  0x8a   :  { %v1920_v38 = vpop.f32.mrf.mxu0 }
  0x8b   :  { %v253_v42 = vsel %vm164_vm1, %v1920_v38, 0.0  ;;  %v263_v47 = vmul.f32 %v1920_v38, %v1920_v38 }
  0x8d   :  { %v267_v52 = vsel %vm164_vm1, %v263_v47, 0.0 }
  0x91   :  { %v1922_v40 = vpop.f32.mrf.mxu3 }
  0x92   :  { %v254_v43 = vsel %vm164_vm1, %v1922_v40, 0.0  ;;  %v1932_v45 = vpop.f32.mrf.mxu0  ;;  %v264_v48 = vmul.f32 %v1922_v40, %v1922_v40 }
  0x93   :  { %v255_v46 = vadd.f32 %v254_v43, %v253_v42  ;;  %v256_v49 = vsel %vm164_vm1, %v1932_v45, 0.0  ;;  %v265_v54 = vmul.f32 %v1932_v45, %v1932_v45 }
  0x94   :  { %v268_v53 = vsel %vm164_vm1, %v264_v48, 0.0 }
  0x95   :  { %v257_v51 = vadd.f32 %v256_v49, %v255_v46  ;;  %v269_v58 = vadd.f32 %v268_v53, %v267_v52  ;;  %v270_v59 = vsel %vm164_vm1, %v265_v54, 0.0 }
  0x97   :  { %v271_v61 = vadd.f32 %v270_v59, %v269_v58 }
  0x9d   :  { %300 = vperm.xlu0 %1724, %v150_v12  }
  0xa5   :  { %1727 = vset.pattern.permute.xlu0 %v1841_v3 }
  0xa6   :  { %141 = vperm.xlu0 %1727, %v88_v35  }
  0xf4   :  { %v53_v7 = vpop.xlane.xlu0 %52 }
  0xf5   :  { %v54_v11 = vmul.f32 0.0078125, %v53_v7 }
  0xf7   :  { %v59_v14 = vmul.f32 %v54_v11, %v54_v11  ;;  %v62_v28 = vsub.f32 %v49_v4, %v54_v11 }
  0xfc   :  { %v57_v13 = vpop.xlane.xlu0 %56 }
  0xfd   :  { %v58_v15 = vmul.f32 0.0078125, %v57_v13 }
  0xff   :  { %v60_v16 = vsub.f32 %v58_v15, %v59_v14 }
 0x101   :  { %v61_v18 = vmax.f32 %v60_v16, 0.0 }
 0x103   :  { %v63_v19 = vadd.f32 1e-05, %v61_v18 }
 0x105   :  { %1730 = vrsqrt.f32 %v63_v19  ;;  %vm70_vm4 = vweird.f32 %v63_v19 }
 0x10b   :  { %v1731_v21 = vpop.eup %1730 }
 0x10c   :  { %v65_v22 = vmul.f32 %v1731_v21, %v63_v19  ;;  %vm71_vm3 = vweird.f32 %v1731_v21 }
 0x10d   :  { %vm72_vm5 = vmor %vm70_vm4, %vm71_vm3 }
 0x10e   :  { %v66_v23 = vmul.f32 %v1731_v21, %v65_v22 }
 0x110   :  { %v67_v25 = vmul.f32 0.5, %v66_v23 }
 0x112   :  { %v68_v26 = vsub.f32 1.5, %v67_v25 }
 0x114   :  { %v69_v27 = vmul.f32 %v1731_v21, %v68_v26 }
 0x116   :  { %v73_v29 = vsel %vm72_vm5, %v1731_v21, %v69_v27 }
 0x117   :  { %v74_v30 = vmul.f32 %v73_v29, %v62_v28 }
 0x119   :  { %v79_v32 = vmul.f32 %v77_v24, %v74_v30 }
 0x11b   :  { %v84_v33 = vadd.f32 %v82_v31, %v79_v32  ;;  %v301_v31 = vpop.permute.xlu0 %300 }
 0x11d   :  { %vm85_vm6 = vcmp.ge.f32.partialorder %v84_v33, 0.0  ;;  %v86_v34 = vmul.f32 0.2, %v84_v33 }
 0x11f   :  { %v87_v36 = vsel %vm85_vm6, %v84_v33, %v86_v34 }
 0x120   :  { %107 = vmatpush.msra.mxu1 %v87_v36 }
 0x121   :  { %1640 = vmatmul.msk.f32.vlgmr.msra.gmra.mxu1 %vm28_vm0, %v88_v35 }
 0x122   :  { %1647 = vmatpush.msk.msrb.mxu1 %vm164_vm1, %v159_v37 }
 0x129   :  { %1648 = vmatmul.msk.f32.vlgmr.msrb.gmra.mxu1 %vm160_vm2, %v150_v12 }
 0x19e   :  { %v1924_v41 = vpop.f32.mrf.mxu1 }
 0x19f   :  { %v115_v44 = vmul.f32 %v1924_v41, %v1924_v41 }
 0x1a1   :  { %116 = vadd.xlane.f32.xlu1 %v115_v44 }
 0x1a6   :  { %v250_v50 = vpop.f32.mrf.mxu1 }
 0x1a7   :  { %v258_v55 = vsel %vm164_vm1, %v250_v50, 0.0  ;;  %v266_v57 = vmul.f32 %v250_v50, %v250_v50 }
 0x1a8   :  { %v259_v56 = vadd.f32 %v258_v55, %v257_v51 }
 0x1a9   :  { %v272_v60 = vsel %vm164_vm1, %v266_v57, 0.0 }
 0x1aa   :  { %260 = vadd.xlane.f32.xlu2 %v259_v56  ;;  %v273_v62 = vadd.f32 %v272_v60, %v271_v61  ;;  %v142_v60 = vpop.permute.xlu0 %141 }
 0x1b2   :  { %274 = vadd.xlane.f32.xlu2 %v273_v62 }
 0x1ba   :  { %112 = vadd.xlane.f32.xlu2 %v1924_v41  ;;  %470 = vperm.xlu1 %1725, %v1951_v63  }
 0x1d2   :  { %136 = vperm.xlu2 %1726, %v88_v35  }
 0x1da   :  { %1728 = vset.pattern.permute.xlu2 %v1843_v39 }
 0x214   :  { %v117_v9 = vpop.xlane.xlu1 %116 }
 0x215   :  { %v118_v12 = vmul.f32 0.0078125, %v117_v9 }
 0x21d   :  { %v261_v0 = vpop.xlane.xlu2 %260 }
 0x21e   :  { %v262_v1 = vmul.f32 0.001953125, %v261_v0 }
 0x220   :  { %v277_v4 = vmul.f32 %v262_v1, %v262_v1  ;;  %v280_v25 = vsub.f32 %v1920_v38, %v262_v1  ;;  %v281_v26 = vsub.f32 %v1922_v40, %v262_v1  ;;  %v282_v27 = vsub.f32 %v1932_v45, %v262_v1 }
 0x221   :  { %v283_v28 = vsub.f32 %v250_v50, %v262_v1 }
 0x225   :  { %v275_v3 = vpop.xlane.xlu2 %274 }
 0x226   :  { %v276_v5 = vmul.f32 0.001953125, %v275_v3 }
 0x228   :  { %v278_v6 = vsub.f32 %v276_v5, %v277_v4 }
 0x22a   :  { %v279_v7 = vmax.f32 %v278_v6, 0.0 }
 0x22c   :  { %v284_v8 = vadd.f32 1e-05, %v279_v7 }
 0x22d   :  { %v113_v10 = vpop.xlane.xlu2 %112 }
 0x22e   :  { %1732 = vrsqrt.f32 %v284_v8  ;;  %v1955_v11 = vmul.f32 0.0078125, %v113_v10  ;;  %vm291_vm8 = vweird.f32 %v284_v8 }
 0x230   :  { %v119_v13 = vmul.f32 %v1955_v11, %v1955_v11  ;;  %v122_v55 = vsub.f32 %v1924_v41, %v1955_v11 }
 0x232   :  { %v120_v14 = vsub.f32 %v118_v12, %v119_v13 }
 0x234   :  { %v1733_v15 = vpop.eup %1732  ;;  %v121_v16 = vmax.f32 %v120_v14, 0.0 }
 0x235   :  { %v286_v17 = vmul.f32 %v1733_v15, %v284_v8  ;;  %vm292_vm7 = vweird.f32 %v1733_v15  ;;  %v137_v58 = vpop.permute.xlu2 %136 }
 0x236   :  { %v123_v18 = vadd.f32 1e-05, %v121_v16  ;;  %vm293_vm9 = vmor %vm291_vm8, %vm292_vm7 }
 0x237   :  { %v287_v19 = vmul.f32 %v1733_v15, %v286_v17 }
 0x238   :  { %1734 = vrsqrt.f32 %v123_v18  ;;  %vm130_vm15 = vweird.f32 %v123_v18 }
 0x239   :  { %v288_v21 = vmul.f32 0.5, %v287_v19 }
 0x23b   :  { %v289_v22 = vsub.f32 1.5, %v288_v21 }
 0x23d   :  { %v290_v23 = vmul.f32 %v1733_v15, %v289_v22 }
 0x23e   :  { %v1735_v24 = vpop.eup %1734 }
 0x23f   :  { %v294_v29 = vsel %vm293_vm9, %v1733_v15, %v290_v23  ;;  %v125_v30 = vmul.f32 %v1735_v24, %v123_v18  ;;  %vm131_vm10 = vweird.f32 %v1735_v24 }
 0x240   :  { %v295_v32 = vmul.f32 %v294_v29, %v280_v25  ;;  %v296_v33 = vmul.f32 %v294_v29, %v281_v26  ;;  %v297_v34 = vmul.f32 %v294_v29, %v282_v27  ;;  %v298_v35 = vmul.f32 %v294_v29, %v283_v28  ;;  %vm132_vm3 = vmor %vm130_vm15, %vm131_vm10 }
 0x241   :  { %v126_v36 = vmul.f32 %v1735_v24, %v125_v30  ;;  %vm702_vm10 = vcmask 523264  }
 0x242   :  { %v303_v37 = vmul.f32 %v301_v31, %v295_v32  ;;  %v304_v39 = vmul.f32 %v301_v31, %v296_v33  ;;  %v305_v42 = vmul.f32 %v301_v31, %v297_v34  ;;  %v306_v43 = vmul.f32 %v301_v31, %v298_v35 }
 0x243   :  { %v127_v44 = vmul.f32 0.5, %v126_v36 }
 0x244   :  { %v313_v46 = vadd.f32 %v309_v2, %v305_v42  ;;  %v314_v38 = vadd.f32 %v309_v2, %v306_v43  ;;  %v311_v47 = vadd.f32 %v309_v2, %v303_v37  ;;  %v312_v40 = vadd.f32 %v309_v2, %v304_v39 }
 0x245   :  { %v128_v48 = vsub.f32 1.5, %v127_v44 }
 0x246   :  { %vm315_vm11 = vcmp.ge.f32.partialorder %v311_v47, 0.0  ;;  %v319_v45 = vmul.f32 0.2, %v311_v47  ;;  %vm316_vm12 = vcmp.ge.f32.partialorder %v312_v40, 0.0  ;;  %v320_v49 = vmul.f32 0.2, %v312_v40 }
 0x247   :  { %vm317_vm13 = vcmp.ge.f32.partialorder %v313_v46, 0.0  ;;  %v321_v50 = vmul.f32 0.2, %v313_v46  ;;  %vm318_vm14 = vcmp.ge.f32.partialorder %v314_v38, 0.0  ;;  %v322_v51 = vmul.f32 0.2, %v314_v38 }
 0x248   :  { %v323_v52 = vsel %vm315_vm11, %v311_v47, %v319_v45  ;;  %v324_v53 = vsel %vm316_vm12, %v312_v40, %v320_v49  ;;  %v129_v54 = vmul.f32 %v1735_v24, %v128_v48  ;;  %v471_v47 = vpop.permute.xlu1 %470 }
 0x249   :  { %1649 = vmatpush.msk.msra.mxu2 %vm164_vm1, %v323_v52  ;;  %1651 = vmatpush.msk.msrb.mxu3 %vm164_vm1, %v324_v53  ;;  %v325_v56 = vsel %vm317_vm13, %v313_v46, %v321_v50  ;;  %v326_v57 = vsel %vm318_vm14, %v314_v38, %v322_v51 }
 0x24a   :  { %1653 = vmatpush.msk.msrb.mxu0 %vm164_vm1, %v325_v56  ;;  %1655 = vmatpush.msk.msra.mxu1 %vm164_vm1, %v326_v57  ;;  %v133_v59 = vsel %vm132_vm3, %v1735_v24, %v129_v54 }
 0x24b   :  { %1650 = vmatmul.msk.f32.vlgmr.msra.gmra.mxu2 %vm160_vm2, %v1951_v63  ;;  %1652 = vmatmul.msk.f32.vlgmr.msrb.gmra.mxu3 %vm160_vm2, %v1951_v63  ;;  %v134_v41 = vmul.f32 %v133_v59, %v122_v55 }
 0x24c   :  { %1654 = vmatmul.msk.f32.vlgmr.msrb.gmra.mxu0 %vm160_vm2, %v1951_v63  ;;  %1656 = vmatmul.msk.f32.vlgmr.msra.gmra.mxu1 %vm160_vm2, %v1951_v63 }
 0x24d   :  { %v139_v61 = vmul.f32 %v137_v58, %v134_v41 }
 0x24f   :  { %v144_v62 = vadd.f32 %v142_v60, %v139_v61 }
 0x251   :  { %vm145_vm4 = vcmp.ge.f32.partialorder %v144_v62, 0.0  ;;  %v146_v0 = vmul.f32 0.2, %v144_v62 }
 0x253   :  { %v1977_v1 = vsel %vm145_vm4, %v144_v62, %v146_v0 }
 0x254   :  { %590 = vrot.lane.b32.xlu0 %v1977_v1, %s1844_s5 }
 0x276   :  { %492 = vxpose.xlu0.b32.start.end [1/1] (short) (narrow) %v1977_v1, 64 }
 0x2c6   :  { %v1989_v60 = vpop.permute.xlu0 %590 }
 0x2c9   :  { %v400_v2 = vpop.f32.mrf.mxu0  ;;  %v420_v8 = vpop.f32.mrf.mxu1 }
 0x2ca   :  { %v431_v10 = vmul.f32 %v400_v2, %v400_v2  ;;  %v432_v13 = vmul.f32 %v420_v8, %v420_v8 }
 0x2ce   :  { %v360_v3 = vpop.f32.mrf.mxu2  ;;  %v380_v4 = vpop.f32.mrf.mxu3 }
 0x2cf   :  { %v429_v5 = vmul.f32 %v360_v3, %v360_v3  ;;  %v423_v6 = vadd.f32 %v380_v4, %v360_v3  ;;  %v430_v7 = vmul.f32 %v380_v4, %v380_v4 }
 0x2d1   :  { %v424_v9 = vadd.f32 %v423_v6, %v400_v2  ;;  %v433_v12 = vadd.f32 %v430_v7, %v429_v5 }
 0x2d3   :  { %v425_v11 = vadd.f32 %v424_v9, %v420_v8  ;;  %v434_v14 = vadd.f32 %v433_v12, %v431_v10 }
 0x2d5   :  { %426 = vadd.xlane.f32.xlu2 %v425_v11  ;;  %v435_v15 = vadd.f32 %v434_v14, %v432_v13 }
 0x2dd   :  { %436 = vadd.xlane.f32.xlu2 %v435_v15 }
 0x2f5   :  { %462 = vperm.xlu2 %1728, %v1951_v63  }
 0x31a   :  { %v508_v61 = vpop.trf.xlu0 }
 0x322   :  { %v509_v62 = vpop.trf.xlu0 }
 0x32a   :  { %v510_v0 = vpop.trf.xlu0 }
 0x348   :  { %v427_v16 = vpop.xlane.xlu2 %426 }
 0x349   :  { %v428_v17 = vmul.f32 0.001953125, %v427_v16 }
 0x34b   :  { %v439_v19 = vmul.f32 %v428_v17, %v428_v17  ;;  %v442_v31 = vsub.f32 %v360_v3, %v428_v17  ;;  %v443_v63 = vsub.f32 %v380_v4, %v428_v17  ;;  %v444_v32 = vsub.f32 %v400_v2, %v428_v17  ;;  %v511_v2 = vpop.trf.xlu0 }
 0x34c   :  { %v445_v33 = vsub.f32 %v420_v8, %v428_v17 }
 0x350   :  { %v437_v18 = vpop.xlane.xlu2 %436 }
 0x351   :  { %v438_v21 = vmul.f32 0.001953125, %v437_v18 }
 0x353   :  { %v440_v22 = vsub.f32 %v438_v21, %v439_v19  ;;  %v512_v4 = vpop.trf.xlu0 }
 0x355   :  { %v441_v23 = vmax.f32 %v440_v22, 0.0 }
 0x357   :  { %v446_v24 = vadd.f32 1e-05, %v441_v23 }
 0x358   :  { %v463_v35 = vpop.permute.xlu2 %462 }
 0x359   :  { %1736 = vrsqrt.f32 %v446_v24  ;;  %vm453_vm2 = vweird.f32 %v446_v24 }
 0x35b   :  { %v513_v5 = vpop.trf.xlu0 }
 0x35f   :  { %v1737_v25 = vpop.eup %1736 }
 0x360   :  { %v448_v26 = vmul.f32 %v1737_v25, %v446_v24  ;;  %vm454_vm1 = vweird.f32 %v1737_v25 }
 0x361   :  { %vm455_vm5 = vmor %vm453_vm2, %vm454_vm1 }
 0x362   :  { %v449_v27 = vmul.f32 %v1737_v25, %v448_v26 }
 0x363   :  { %v514_v6 = vpop.trf.xlu0 }
 0x364   :  { %v450_v28 = vmul.f32 0.5, %v449_v27 }
 0x366   :  { %v451_v29 = vsub.f32 1.5, %v450_v28 }
 0x368   :  { %v452_v30 = vmul.f32 %v1737_v25, %v451_v29 }
 0x36a   :  { %v456_v34 = vsel %vm455_vm5, %v1737_v25, %v452_v30 }
 0x36b   :  { %v457_v36 = vmul.f32 %v456_v34, %v442_v31  ;;  %v458_v37 = vmul.f32 %v456_v34, %v443_v63  ;;  %v459_v39 = vmul.f32 %v456_v34, %v444_v32  ;;  %v460_v42 = vmul.f32 %v456_v34, %v445_v33  ;;  %v515_v7 = vpop.trf.xlu0 }
 0x36d   :  { %v465_v43 = vmul.f32 %v463_v35, %v457_v36  ;;  %v466_v44 = vmul.f32 %v463_v35, %v458_v37  ;;  %v467_v46 = vmul.f32 %v463_v35, %v459_v39  ;;  %v468_v38 = vmul.f32 %v463_v35, %v460_v42 }
 0x36f   :  { %v473_v40 = vadd.f32 %v471_v47, %v465_v43  ;;  %v474_v48 = vadd.f32 %v471_v47, %v466_v44  ;;  %v475_v45 = vadd.f32 %v471_v47, %v467_v46  ;;  %v476_v49 = vadd.f32 %v471_v47, %v468_v38 }
 0x371   :  { %vm477_vm6 = vcmp.ge.f32.partialorder %v473_v40, 0.0  ;;  %vm478_vm7 = vcmp.ge.f32.partialorder %v474_v48, 0.0  ;;  %vm479_vm8 = vcmp.ge.f32.partialorder %v475_v45, 0.0  ;;  %vm480_vm9 = vcmp.ge.f32.partialorder %v476_v49, 0.0 }
 0x372   :  { %v481_v50 = vmul.f32 0.2, %v473_v40  ;;  %v482_v51 = vmul.f32 0.2, %v474_v48  ;;  %v483_v52 = vmul.f32 0.2, %v475_v45 }
 0x373   :  { %v484_v53 = vmul.f32 0.2, %v476_v49 }
 0x374   :  { %v485_v54 = vsel %vm477_vm6, %v473_v40, %v481_v50  ;;  %v486_v55 = vsel %vm478_vm7, %v474_v48, %v482_v51  ;;  %v487_v56 = vsel %vm479_vm8, %v475_v45, %v483_v52 }
 0x375   :  { %v488_v57 = vsel %vm480_vm9, %v476_v49, %v484_v53  ;;  %v489_v58 = vmax.f32 %v485_v54, %v486_v55 }
 0x376   :  { %v490_v59 = vmax.f32 %v487_v56, %v488_v57 }
 0x378   :  { %v1983_v41 = vmax.f32 %v489_v58, %v490_v59 }
 0x37a   :  { %626 = vrot.lane.b32.xlu2 %v1983_v41, %s1844_s5  ;;  %563 = vmatpush.msra.mxu0 %v1983_v41 }
 0x37b   :  { %1714 = vmatpush.msrb.mxu2 %v1983_v41  ;;  %1657 = vmatmul.msk.f32.vlgmr.msra.gmra.mxu0 %vm28_vm0, %v508_v61 }
 0x37c   :  { %1659 = vmatmul.msk.f32.vlgmr.msrb.gmra.mxu2 %vm28_vm0, %v510_v0 }
 0x383   :  { %1658 = vmatmul.msk.f32.gmra.mxu0 %vm28_vm0, %v509_v62 }
 0x384   :  { %1660 = vmatmul.msk.f32.gmra.mxu2 %vm28_vm0, %v511_v2 }
 0x38c   :  { %1661 = vmatmul.msk.f32.gmra.mxu2 %vm28_vm0, %v512_v4 }
 0x394   :  { %1662 = vmatmul.msk.f32.gmra.mxu2 %vm28_vm0, %v513_v5 }
 0x39c   :  { %1663 = vmatmul.msk.f32.gmra.mxu2 %vm28_vm0, %v514_v6 }
 0x3a0   :  { %593 = vxpose.xlu2.b32.start.end [1/1] (short) (narrow) %v1989_v60, 64 }
 0x3a4   :  { %1664 = vmatmul.msk.f32.gmra.mxu2 %vm28_vm0, %v515_v7 }
 0x3d4   :  { %v1996_v3 = vpop.permute.xlu2 %626 }
 0x3d5   :  { %668 = vmatpush.msrb.mxu1 %v1996_v3  ;;  %1715 = vmatpush.msra.mxu3 %v1996_v3 }
 0x3f8   :  { %v2005_v9 = vpop.f32.mrf.mxu0 }
 0x3f9   :  { %v694_v10 = vmul.f32 %v2005_v9, %v2005_v9 }
 0x3fb   :  { %v703_v11 = vsel %vm702_vm10, %v694_v10, 0.0 }
 0x3fc   :  { %704 = vadd.xlane.f32.xlu1 %v703_v11 }
 0x3ff   :  { %v2011_v14 = vpop.f32.mrf.mxu2 }
 0x400   :  { %v696_v15 = vmul.f32 %v2011_v14, %v2011_v14  ;;  %v2022_v21 = vpop.f32.mrf.mxu0 }
 0x401   :  { %v695_v22 = vmul.f32 %v2022_v21, %v2022_v21 }
 0x402   :  { %v709_v16 = vsel %vm702_vm10, %v696_v15, 0.0 }
 0x403   :  { %v706_v24 = vsel %vm702_vm10, %v695_v22, 0.0 }
 0x404   :  { %710 = vadd.xlane.f32.xlu1 %v709_v16  ;;  %707 = vadd.xlane.f32.xlu0 %v706_v24 }
 0x407   :  { %v2017_v18 = vpop.f32.mrf.mxu2 }
 0x408   :  { %v697_v19 = vmul.f32 %v2017_v18, %v2017_v18 }
 0x40a   :  { %v712_v23 = vsel %vm702_vm10, %v697_v19, 0.0 }
 0x40c   :  { %713 = vadd.xlane.f32.xlu1 %v712_v23 }
 0x40f   :  { %v2028_v26 = vpop.f32.mrf.mxu2 }
 0x410   :  { %v698_v27 = vmul.f32 %v2028_v26, %v2028_v26 }
 0x412   :  { %v715_v28 = vsel %vm702_vm10, %v698_v27, 0.0 }
 0x414   :  { %716 = vadd.xlane.f32.xlu1 %v715_v28 }
 0x417   :  { %v2034_v30 = vpop.f32.mrf.mxu2 }
 0x418   :  { %v699_v31 = vmul.f32 %v2034_v30, %v2034_v30 }
 0x41a   :  { %v718_v63 = vsel %vm702_vm10, %v699_v31, 0.0 }
 0x41c   :  { %719 = vadd.xlane.f32.xlu1 %v718_v63 }
 0x41f   :  { %v2040_v33 = vpop.f32.mrf.mxu2 }
 0x420   :  { %v700_v34 = vmul.f32 %v2040_v33, %v2040_v33 }
 0x422   :  { %v721_v35 = vsel %vm702_vm10, %v700_v34, 0.0 }
 0x424   :  { %722 = vadd.xlane.f32.xlu1 %v721_v35 }
 0x427   :  { %v2046_v37 = vpop.f32.mrf.mxu2 }
 0x428   :  { %v701_v39 = vmul.f32 %v2046_v37, %v2046_v37 }
 0x42a   :  { %v724_v42 = vsel %vm702_vm10, %v701_v39, 0.0 }
 0x42c   :  { %725 = vadd.xlane.f32.xlu1 %v724_v42 }
 0x439   :  { %v609_v8 = vpop.trf.xlu2 }
 0x43a   :  { %1665 = vmatmul.msk.f32.vlgmr.msrb.gmra.mxu1 %vm28_vm0, %v609_v8 }
 0x441   :  { %v610_v12 = vpop.trf.xlu2 }
 0x442   :  { %1666 = vmatmul.msk.f32.gmra.mxu1 %vm28_vm0, %v610_v12 }
 0x449   :  { %v611_v13 = vpop.trf.xlu2 }
 0x44a   :  { %1667 = vmatmul.msk.f32.gmra.mxu1 %vm28_vm0, %v611_v13 }
 0x451   :  { %v612_v17 = vpop.trf.xlu2 }
 0x452   :  { %1668 = vmatmul.msk.f32.vlgmr.msra.gmra.mxu3 %vm28_vm0, %v612_v17 }
 0x459   :  { %v613_v25 = vpop.trf.xlu2 }
 0x45a   :  { %1669 = vmatmul.msk.f32.gmra.mxu3 %vm28_vm0, %v613_v25 }
 0x461   :  { %v614_v29 = vpop.trf.xlu2 }
 0x462   :  { %1670 = vmatmul.msk.f32.gmra.mxu3 %vm28_vm0, %v614_v29 }
 0x469   :  { %v615_v32 = vpop.trf.xlu2 }
 0x46a   :  { %1671 = vmatmul.msk.f32.gmra.mxu3 %vm28_vm0, %v615_v32 }
 0x46f   :  { %v705_v38 = vpop.xlane.xlu1 %704 }
 0x471   :  { %v616_v36 = vpop.trf.xlu2 }
 0x472   :  { %1672 = vmatmul.msk.f32.gmra.mxu3 %vm28_vm0, %v616_v36 }
 0x477   :  { %v711_v47 = vpop.xlane.xlu1 %710  ;;  %v708_v52 = vpop.xlane.xlu0 %707 }
 0x478   :  { %v727_v53 = vadd.f32 %v708_v52, %v705_v38 }
 0x47a   :  { %v728_v55 = vadd.f32 %v727_v53, %v711_v47 }
 0x47f   :  { %v714_v40 = vpop.xlane.xlu1 %713 }
 0x480   :  { %v729_v56 = vadd.f32 %v728_v55, %v714_v40 }
 0x487   :  { %v717_v50 = vpop.xlane.xlu1 %716 }
 0x488   :  { %v730_v59 = vadd.f32 %v729_v56, %v717_v50 }
 0x48f   :  { %v720_v62 = vpop.xlane.xlu1 %719 }
 0x490   :  { %v731_v0 = vadd.f32 %v730_v59, %v720_v62 }
 0x497   :  { %v723_v19 = vpop.xlane.xlu1 %722 }
 0x498   :  { %v732_v31 = vadd.f32 %v731_v0, %v723_v19 }
 0x49f   :  { %v726_v22 = vpop.xlane.xlu1 %725 }
 0x4a0   :  { %v733_v34 = vadd.f32 %v732_v31, %v726_v22 }
 0x4a2   :  { %v734_v39 = vrot.slane %v733_v34, 4 }
 0x4b7   :  { %v2052_v43 = vpop.f32.mrf.mxu1 }
 0x4b8   :  { %v740_v44 = vmul.f32 %v2052_v43, %v2052_v43 }
 0x4ba   :  { %v748_v46 = vsel %vm702_vm10, %v740_v44, 0.0  ;;  %v735_v44 = vadd.f32 %v734_v39, %v733_v34 }
 0x4bb   :  { %749 = vadd.xlane.f32.xlu2 %v748_v46 }
 0x4bc   :  { %v736_v40 = vrot.slane %v735_v44, 2 }
 0x4be   :  { %v737_v50 = vadd.f32 %v736_v40, %v735_v44 }
 0x4bf   :  { %v2062_v51 = vpop.f32.mrf.mxu1 }
 0x4c0   :  { %v741_v54 = vmul.f32 %v2062_v51, %v2062_v51 }
 0x4c2   :  { %v751_v58 = vsel %vm702_vm10, %v741_v54, 0.0  ;;  %v738_v54 = vrot.slane %v737_v50, 1 }
 0x4c7   :  { %v2072_v4 = vpop.f32.mrf.mxu1 }
 0x4c8   :  { %v742_v6 = vmul.f32 %v2072_v4, %v2072_v4 }
 0x4ca   :  { %v754_v7 = vsel %vm702_vm10, %v742_v6, 0.0 }
 0x4d5   :  { %v2057_v48 = vpop.f32.mrf.mxu3 }
 0x4d6   :  { %v743_v45 = vmul.f32 %v2057_v48, %v2057_v48 }
 0x4d8   :  { %v757_v49 = vsel %vm702_vm10, %v743_v45, 0.0 }
 0x4d9   :  { %758 = vadd.xlane.f32.xlu1 %v757_v49 }
 0x4dd   :  { %v2066_v57 = vpop.f32.mrf.mxu3 }
 0x4de   :  { %v744_v61 = vmul.f32 %v2066_v57, %v2066_v57 }
 0x4e0   :  { %v760_v2 = vsel %vm702_vm10, %v744_v61, 0.0 }
 0x4e1   :  { %752 = vadd.xlane.f32.xlu1 %v751_v58  ;;  %v739_v58 = vadd.f32 %v738_v54, %v737_v50 }
 0x4e5   :  { %v2074_v5 = vpop.f32.mrf.mxu3 }
 0x4e6   :  { %v745_v8 = vmul.f32 %v2074_v5, %v2074_v5 }
 0x4e8   :  { %v763_v11 = vsel %vm702_vm10, %v745_v8, 0.0 }
 0x4e9   :  { %761 = vadd.xlane.f32.xlu1 %v760_v2 }
 0x4ed   :  { %v688_v10 = vpop.f32.mrf.mxu3 }
 0x4ee   :  { %v746_v12 = vmul.f32 %v688_v10, %v688_v10 }
 0x4f0   :  { %v766_v13 = vsel %vm702_vm10, %v746_v12, 0.0 }
 0x4f1   :  { %755 = vadd.xlane.f32.xlu1 %v754_v7 }
 0x4f5   :  { %v691_v15 = vpop.f32.mrf.mxu3 }
 0x4f6   :  { %v747_v16 = vmul.f32 %v691_v15, %v691_v15 }
 0x4f8   :  { %v769_v17 = vsel %vm702_vm10, %v747_v16, 0.0 }
 0x4f9   :  { %764 = vadd.xlane.f32.xlu1 %v763_v11 }
 0x501   :  { %767 = vadd.xlane.f32.xlu1 %v766_v13 }
 0x509   :  { %770 = vadd.xlane.f32.xlu1 %v769_v17 }
 0x52e   :  { %v750_v28 = vpop.xlane.xlu2 %749 }
 0x54c   :  { %v759_v23 = vpop.xlane.xlu1 %758 }
 0x554   :  { %v753_v24 = vpop.xlane.xlu1 %752 }
 0x555   :  { %v772_v63 = vadd.f32 %v753_v24, %v750_v28 }
 0x55c   :  { %v762_v25 = vpop.xlane.xlu1 %761 }
 0x564   :  { %v756_v27 = vpop.xlane.xlu1 %755 }
 0x565   :  { %v773_v32 = vadd.f32 %v772_v63, %v756_v27 }
 0x567   :  { %v774_v35 = vadd.f32 %v773_v32, %v759_v23 }
 0x569   :  { %v775_v42 = vadd.f32 %v774_v35, %v762_v25 }
 0x56c   :  { %v765_v29 = vpop.xlane.xlu1 %764 }
 0x56d   :  { %v776_v46 = vadd.f32 %v775_v42, %v765_v29 }
 0x574   :  { %v768_v36 = vpop.xlane.xlu1 %767 }
 0x575   :  { %v777_v38 = vadd.f32 %v776_v46, %v768_v36 }
 0x57c   :  { %v771_v47 = vpop.xlane.xlu1 %770 }
 0x57d   :  { %v778_v45 = vadd.f32 %v777_v38, %v771_v47 }
 0x57f   :  { %v779_v49 = vrot.slane %v778_v45, 4 }
 0x581   :  { %v780_v52 = vadd.f32 %v779_v49, %v778_v45 }
 0x583   :  { %v781_v53 = vrot.slane %v780_v52, 2 }
 0x585   :  { %v782_v55 = vadd.f32 %v781_v53, %v780_v52 }
 0x587   :  { %v783_v56 = vrot.slane %v782_v55, 1 }
 0x589   :  { %v784_v59 = vadd.f32 %v783_v56, %v782_v55 }
 0x58b   :  { %v785_v61 = vadd.f32 %v784_v59, %v739_v58 }
 0x58d   :  { %1738 = vrsqrt.f32 %v785_v61  ;;  %vm792_vm12 = vweird.f32 %v785_v61 }
 0x593   :  { %v1739_v62 = vpop.eup %1738 }
 0x594   :  { %v787_v0 = vmul.f32 %v1739_v62, %v785_v61  ;;  %vm793_vm11 = vweird.f32 %v1739_v62 }
 0x595   :  { %vm794_vm13 = vmor %vm792_vm12, %vm793_vm11 }
 0x596   :  { %v788_v2 = vmul.f32 %v1739_v62, %v787_v0 }
 0x598   :  { %v789_v6 = vmul.f32 0.5, %v788_v2 }
 0x59a   :  { %v790_v7 = vsub.f32 1.5, %v789_v6 }
 0x59c   :  { %v791_v8 = vmul.f32 %v1739_v62, %v790_v7 }
 0x59e   :  { %v795_v11 = vsel %vm794_vm13, %v1739_v62, %v791_v8 }
 0x59f   :  { %v803_v12 = vmul.f32 %v795_v11, %v2046_v37  ;;  %v841_v13 = vmul.f32 %v795_v11, %v691_v15  ;;  %v802_v16 = vmul.f32 %v795_v11, %v2040_v33  ;;  %v840_v17 = vmul.f32 %v795_v11, %v688_v10 }
 0x5a0   :  { %v801_v19 = vmul.f32 %v795_v11, %v2034_v30  ;;  %v839_v22 = vmul.f32 %v795_v11, %v2074_v5  ;;  %v800_v23 = vmul.f32 %v795_v11, %v2028_v26  ;;  %v838_v24 = vmul.f32 %v795_v11, %v2066_v57 }
 0x5a1   :  { %1740 = vtanh.f32 %v803_v12  ;;  %v799_v25 = vmul.f32 %v795_v11, %v2017_v18  ;;  %v837_v37 = vmul.f32 %v795_v11, %v2057_v48  ;;  %v798_v10 = vmul.f32 %v795_v11, %v2011_v14 }
 0x5a2   :  { %1742 = vtanh.f32 %v841_v13  ;;  %v836_v5 = vmul.f32 %v795_v11, %v2072_v4  ;;  %v797_v26 = vmul.f32 %v795_v11, %v2022_v21  ;;  %v835_v18 = vmul.f32 %v795_v11, %v2062_v51 }
 0x5a3   :  { %1744 = vtanh.f32 %v802_v16  ;;  %v796_v14 = vmul.f32 %v795_v11, %v2005_v9  ;;  %v834_v4 = vmul.f32 %v795_v11, %v2052_v43 }
 0x5a4   :  { %1746 = vtanh.f32 %v840_v17 }
 0x5a5   :  { %1748 = vtanh.f32 %v801_v19 }
 0x5a6   :  { %1750 = vtanh.f32 %v839_v22 }
 0x5a7   :  { %v1741_v33 = vpop.eup %1740  ;;  %1752 = vtanh.f32 %v800_v23 }
 0x5a8   :  { %v1743_v30 = vpop.eup %1742  ;;  %822 = vmatpush.msrb.mxu0 %v1741_v33  ;;  %1754 = vtanh.f32 %v838_v24 }
 0x5a9   :  { %v1745_v15 = vpop.eup %1744  ;;  %860 = vmatpush.msra.mxu1 %v1743_v30  ;;  %1756 = vtanh.f32 %v799_v25 }
 0x5aa   :  { %v1747_v57 = vpop.eup %1746  ;;  %823 = vmatpush.msrb.mxu0 %v1745_v15  ;;  %1758 = vtanh.f32 %v837_v37 }
 0x5ab   :  { %v1749_v48 = vpop.eup %1748  ;;  %861 = vmatpush.msra.mxu1 %v1747_v57  ;;  %1760 = vtanh.f32 %v798_v10 }
 0x5ac   :  { %v1751_v27 = vpop.eup %1750  ;;  %824 = vmatpush.msrb.mxu0 %v1749_v48  ;;  %1762 = vtanh.f32 %v836_v5 }
 0x5ad   :  { %v1753_v28 = vpop.eup %1752  ;;  %862 = vmatpush.msra.mxu1 %v1751_v27  ;;  %1764 = vtanh.f32 %v797_v26 }
 0x5ae   :  { %v1755_v29 = vpop.eup %1754  ;;  %825 = vmatpush.msrb.mxu0 %v1753_v28  ;;  %1766 = vtanh.f32 %v835_v18 }
 0x5af   :  { %v1757_v21 = vpop.eup %1756  ;;  %863 = vmatpush.msra.mxu1 %v1755_v29  ;;  %1768 = vtanh.f32 %v796_v14 }
 0x5b0   :  { %v1759_v51 = vpop.eup %1758  ;;  %826 = vmatpush.msrb.mxu0 %v1757_v21  ;;  %1770 = vtanh.f32 %v834_v4 }
 0x5b1   :  { %v1761_v31 = vpop.eup %1760  ;;  %864 = vmatpush.msra.mxu1 %v1759_v51 }
 0x5b2   :  { %v1763_v9 = vpop.eup %1762  ;;  %827 = vmatpush.msrb.mxu0 %v1761_v31 }
 0x5b3   :  { %v1765_v63 = vpop.eup %1764  ;;  %865 = vmatpush.msra.mxu1 %v1763_v9 }
 0x5b4   :  { %v1767_v32 = vpop.eup %1766  ;;  %828 = vmatpush.msrb.mxu0 %v1765_v63 }
 0x5b5   :  { %v1769_v43 = vpop.eup %1768  ;;  %866 = vmatpush.msra.mxu1 %v1767_v32 }
 0x5b6   :  { %v1771_v34 = vpop.eup %1770  ;;  %829 = vmatpush.msrb.mxu0 %v1769_v43 }
 0x5b7   :  { %867 = vmatpush.msra.mxu1 %v1771_v34  ;;  %1673 = vmatmul.msk.f32.vlgmr.msrb.gmra.mxu0 %vm702_vm10, %v1977_v1 }
 0x5b8   :  { %1674 = vmatmul.msk.f32.vlgmr.msra.gmra.mxu1 %vm702_vm10, %v1989_v60  ;;  %943 = vmatpush.msra.mxu0 %v1977_v1 }
 0x5b9   :  { %1040 = vmatpush.msrb.mxu1 %v1989_v60 }
 0x634   :  { %v831_v35 = vpop.f32.mrf.mxu0 }
 0x635   :  { %v2105_v36 = vadd.f32 %v831_v35, %v1983_v41  ;;  %v869_v39 = vpop.f32.mrf.mxu1 }
 0x636   :  { %v2108_v42 = vadd.f32 %v869_v39, %v1996_v3 }
 0x637   :  { %1618 = vst.msk [vmem:[%s2381_s6] sm:$0xff] %vm702_vm10, %v2105_v36  ;;  %872 = vxpose.xlu1.b32.start.end [1/1] (short) (narrow) %v2105_v36, 64 }
 0x638   :  { %1711 = vst.msk [vmem:[%s2381_s6 + $0x8] sm:$0xff] %vm702_vm10, %v2108_v42  ;;  %969 = vxpose.xlu0.b32.start.end [1/1] (short) (narrow) %v2108_v42, 64 }
 0x69f   :  { %1729 = vset.pattern.permute.xlu0 %v1842_v20 }
 0x6db   :  { %v888_v41 = vpop.trf.xlu1 }
 0x6dc   :  { %1675 = vmatmul.msk.f32.vlgmr.msra.gmra.mxu0 %vm28_vm0, %v888_v41  ;;  %v985_v3 = vpop.trf.xlu0 }
 0x6dd   :  { %1683 = vmatmul.msk.f32.vlgmr.msrb.gmra.mxu1 %vm28_vm0, %v985_v3 }
 0x6e3   :  { %v889_v44 = vpop.trf.xlu1 }
 0x6e4   :  { %1676 = vmatmul.msk.f32.gmra.mxu0 %vm28_vm0, %v889_v44  ;;  %v986_v46 = vpop.trf.xlu0 }
 0x6e5   :  { %1684 = vmatmul.msk.f32.gmra.mxu1 %vm28_vm0, %v986_v46 }
 0x6eb   :  { %v890_v38 = vpop.trf.xlu1 }
 0x6ec   :  { %1677 = vmatmul.msk.f32.gmra.mxu0 %vm28_vm0, %v890_v38  ;;  %v987_v47 = vpop.trf.xlu0 }
 0x6ed   :  { %1685 = vmatmul.msk.f32.gmra.mxu1 %vm28_vm0, %v987_v47 }
 0x6f3   :  { %v891_v40 = vpop.trf.xlu1 }
 0x6f4   :  { %1678 = vmatmul.msk.f32.gmra.mxu0 %vm28_vm0, %v891_v40  ;;  %v988_v20 = vpop.trf.xlu0 }
 0x6f5   :  { %1686 = vmatmul.msk.f32.gmra.mxu1 %vm28_vm0, %v988_v20 }
 0x6fb   :  { %v892_v45 = vpop.trf.xlu1 }
 0x6fc   :  { %1679 = vmatmul.msk.f32.gmra.mxu0 %vm28_vm0, %v892_v45  ;;  %v989_v49 = vpop.trf.xlu0 }
 0x6fd   :  { %1687 = vmatmul.msk.f32.gmra.mxu1 %vm28_vm0, %v989_v49 }
 0x703   :  { %v893_v50 = vpop.trf.xlu1 }
 0x704   :  { %1680 = vmatmul.msk.f32.gmra.mxu0 %vm28_vm0, %v893_v50  ;;  %v990_v52 = vpop.trf.xlu0 }
 0x705   :  { %1688 = vmatmul.msk.f32.gmra.mxu1 %vm28_vm0, %v990_v52 }
 0x70b   :  { %v894_v53 = vpop.trf.xlu1 }
 0x70c   :  { %1681 = vmatmul.msk.f32.gmra.mxu0 %vm28_vm0, %v894_v53  ;;  %v991_v54 = vpop.trf.xlu0 }
 0x70d   :  { %1689 = vmatmul.msk.f32.gmra.mxu1 %vm28_vm0, %v991_v54 }
 0x713   :  { %v895_v55 = vpop.trf.xlu1 }
 0x714   :  { %1682 = vmatmul.msk.f32.gmra.mxu0 %vm28_vm0, %v895_v55  ;;  %v992_v56 = vpop.trf.xlu0 }
 0x715   :  { %1690 = vmatmul.msk.f32.gmra.mxu1 %vm28_vm0, %v992_v56 }
 0x759   :  { %v2139_v58 = vpop.f32.mrf.mxu0 }
 0x75a   :  { %v1066_v59 = vmul.f32 %v2139_v58, %v2139_v58  ;;  %v2143_v61 = vpop.f32.mrf.mxu1 }
 0x75b   :  { %v1111_v0 = vmul.f32 %v2143_v61, %v2143_v61 }
 0x75c   :  { %v1074_v62 = vsel %vm702_vm10, %v1066_v59, 0.0 }
 0x75d   :  { %1075 = vadd.xlane.f32.xlu2 %v1074_v62  ;;  %v1119_v7 = vsel %vm702_vm10, %v1111_v0, 0.0 }
 0x761   :  { %v2148_v2 = vpop.f32.mrf.mxu0 }
 0x762   :  { %v1067_v6 = vmul.f32 %v2148_v2, %v2148_v2  ;;  %v2153_v8 = vpop.f32.mrf.mxu1 }
 0x763   :  { %v1112_v12 = vmul.f32 %v2153_v8, %v2153_v8 }
 0x764   :  { %v1077_v11 = vsel %vm702_vm10, %v1067_v6, 0.0 }
 0x765   :  { %1120 = vadd.xlane.f32.xlu2 %v1119_v7  ;;  %1078 = vadd.xlane.f32.xlu1 %v1077_v11  ;;  %v1122_v16 = vsel %vm702_vm10, %v1112_v12, 0.0 }
 0x769   :  { %v2158_v13 = vpop.f32.mrf.mxu0 }
 0x76a   :  { %v1068_v17 = vmul.f32 %v2158_v13, %v2158_v13  ;;  %v2165_v22 = vpop.f32.mrf.mxu1 }
 0x76b   :  { %v1113_v37 = vmul.f32 %v2165_v22, %v2165_v22 }
 0x76c   :  { %v1080_v24 = vsel %vm702_vm10, %v1068_v17, 0.0 }
 0x76d   :  { %1123 = vadd.xlane.f32.xlu2 %v1122_v16  ;;  %v1125_v33 = vsel %vm702_vm10, %v1113_v37, 0.0 }
 0x771   :  { %v2163_v19 = vpop.f32.mrf.mxu0 }
 0x772   :  { %v1069_v23 = vmul.f32 %v2163_v19, %v2163_v19  ;;  %v2174_v10 = vpop.f32.mrf.mxu1 }
 0x773   :  { %v1114_v30 = vmul.f32 %v2174_v10, %v2174_v10 }
 0x774   :  { %v1083_v25 = vsel %vm702_vm10, %v1069_v23, 0.0 }
 0x775   :  { %1081 = vadd.xlane.f32.xlu2 %v1080_v24  ;;  %1084 = vadd.xlane.f32.xlu0 %v1083_v25  ;;  %v1128_v5 = vsel %vm702_vm10, %v1114_v30, 0.0 }
 0x779   :  { %v2179_v15 = vpop.f32.mrf.mxu0 }
 0x77a   :  { %v1070_v26 = vmul.f32 %v2179_v15, %v2179_v15  ;;  %v2184_v18 = vpop.f32.mrf.mxu1 }
 0x77b   :  { %v1115_v48 = vmul.f32 %v2184_v18, %v2184_v18 }
 0x77c   :  { %v1086_v57 = vsel %vm702_vm10, %v1070_v26, 0.0 }
 0x77d   :  { %1126 = vadd.xlane.f32.xlu2 %v1125_v33  ;;  %v1131_v14 = vsel %vm702_vm10, %v1115_v48, 0.0 }
 0x781   :  { %v2189_v27 = vpop.f32.mrf.mxu0 }
 0x782   :  { %v1071_v4 = vmul.f32 %v2189_v27, %v2189_v27  ;;  %v2194_v29 = vpop.f32.mrf.mxu1 }
 0x783   :  { %v1116_v21 = vmul.f32 %v2194_v29, %v2194_v29 }
 0x784   :  { %v1089_v28 = vsel %vm702_vm10, %v1071_v4, 0.0 }
 0x785   :  { %1129 = vadd.xlane.f32.xlu2 %v1128_v5  ;;  %v1134_v51 = vsel %vm702_vm10, %v1116_v21, 0.0 }
 0x789   :  { %v2199_v31 = vpop.f32.mrf.mxu0 }
 0x78a   :  { %v1072_v9 = vmul.f32 %v2199_v31, %v2199_v31  ;;  %v2204_v32 = vpop.f32.mrf.mxu1 }
 0x78b   :  { %v1117_v43 = vmul.f32 %v2204_v32, %v2204_v32 }
 0x78c   :  { %v1092_v63 = vsel %vm702_vm10, %v1072_v9, 0.0 }
 0x78d   :  { %1087 = vadd.xlane.f32.xlu2 %v1086_v57  ;;  %v1137_v34 = vsel %vm702_vm10, %v1117_v43, 0.0 }
 0x791   :  { %v2209_v35 = vpop.f32.mrf.mxu0 }
 0x792   :  { %v1073_v39 = vmul.f32 %v2209_v35, %v2209_v35  ;;  %v1063_v3 = vpop.f32.mrf.mxu1 }
 0x793   :  { %v1118_v44 = vmul.f32 %v1063_v3, %v1063_v3 }
 0x794   :  { %v1095_v41 = vsel %vm702_vm10, %v1073_v39, 0.0 }
 0x795   :  { %1132 = vadd.xlane.f32.xlu2 %v1131_v14  ;;  %v1140_v46 = vsel %vm702_vm10, %v1118_v44, 0.0 }
 0x79d   :  { %1090 = vadd.xlane.f32.xlu2 %v1089_v28 }
 0x7a5   :  { %1135 = vadd.xlane.f32.xlu2 %v1134_v51 }
 0x7ad   :  { %1093 = vadd.xlane.f32.xlu2 %v1092_v63 }
 0x7b5   :  { %1138 = vadd.xlane.f32.xlu2 %v1137_v34 }
 0x7bd   :  { %1096 = vadd.xlane.f32.xlu2 %v1095_v41 }
 0x7c5   :  { %1141 = vadd.xlane.f32.xlu2 %v1140_v46 }
 0x7d0   :  { %v1076_v38 = vpop.xlane.xlu2 %1075 }
 0x7d8   :  { %v1121_v47 = vpop.xlane.xlu2 %1120  ;;  %v1079_v45 = vpop.xlane.xlu1 %1078 }
 0x7d9   :  { %v1098_v49 = vadd.f32 %v1079_v45, %v1076_v38 }
 0x7e0   :  { %v1124_v40 = vpop.xlane.xlu2 %1123 }
 0x7e1   :  { %v1143_v20 = vadd.f32 %v1124_v40, %v1121_v47 }
 0x7e8   :  { %v1082_v50 = vpop.xlane.xlu2 %1081  ;;  %v1085_v6 = vpop.xlane.xlu0 %1084 }
 0x7e9   :  { %v1099_v52 = vadd.f32 %v1098_v49, %v1082_v50 }
 0x7eb   :  { %v1100_v11 = vadd.f32 %v1099_v52, %v1085_v6 }
 0x7f0   :  { %v1127_v53 = vpop.xlane.xlu2 %1126 }
 0x7f1   :  { %v1144_v17 = vadd.f32 %v1143_v20, %v1127_v53 }
 0x7f8   :  { %v1130_v54 = vpop.xlane.xlu2 %1129 }
 0x7f9   :  { %v1145_v25 = vadd.f32 %v1144_v17, %v1130_v54 }
 0x800   :  { %v1088_v55 = vpop.xlane.xlu2 %1087 }
 0x801   :  { %v1101_v12 = vadd.f32 %v1100_v11, %v1088_v55 }
 0x808   :  { %v1133_v56 = vpop.xlane.xlu2 %1132 }
 0x809   :  { %v1146_v33 = vadd.f32 %v1145_v25, %v1133_v56 }
 0x810   :  { %v1091_v59 = vpop.xlane.xlu2 %1090 }
 0x811   :  { %v1102_v16 = vadd.f32 %v1101_v12, %v1091_v59 }
 0x818   :  { %v1136_v62 = vpop.xlane.xlu2 %1135 }
 0x819   :  { %v1147_v5 = vadd.f32 %v1146_v33, %v1136_v62 }
 0x820   :  { %v1094_v0 = vpop.xlane.xlu2 %1093 }
 0x821   :  { %v1103_v23 = vadd.f32 %v1102_v16, %v1094_v0 }
 0x828   :  { %v1139_v7 = vpop.xlane.xlu2 %1138 }
 0x829   :  { %v1148_v57 = vadd.f32 %v1147_v5, %v1139_v7 }
 0x830   :  { %v1097_v24 = vpop.xlane.xlu2 %1096 }
 0x831   :  { %v1104_v37 = vadd.f32 %v1103_v23, %v1097_v24 }
 0x833   :  { %v1105_v30 = vrot.slane %v1104_v37, 4 }
 0x835   :  { %v1106_v26 = vadd.f32 %v1105_v30, %v1104_v37 }
 0x837   :  { %v1107_v14 = vrot.slane %v1106_v26, 2 }
 0x838   :  { %v1142_v48 = vpop.xlane.xlu2 %1141 }
 0x839   :  { %v1149_v4 = vadd.f32 %v1148_v57, %v1142_v48  ;;  %v1108_v21 = vadd.f32 %v1107_v14, %v1106_v26 }
 0x83b   :  { %v1150_v28 = vrot.slane %v1149_v4, 4  ;;  %v1109_v63 = vrot.slane %v1108_v21, 1 }
 0x83d   :  { %v1151_v51 = vadd.f32 %v1150_v28, %v1149_v4  ;;  %v1110_v39 = vadd.f32 %v1109_v63, %v1108_v21 }
 0x83f   :  { %v1152_v9 = vrot.slane %v1151_v51, 2 }
 0x841   :  { %v1153_v43 = vadd.f32 %v1152_v9, %v1151_v51 }
 0x843   :  { %v1154_v34 = vrot.slane %v1153_v43, 1 }
 0x845   :  { %v1155_v41 = vadd.f32 %v1154_v34, %v1153_v43 }
 0x847   :  { %v1156_v44 = vadd.f32 %v1155_v41, %v1110_v39 }
 0x849   :  { %1772 = vrsqrt.f32 %v1156_v44  ;;  %vm1163_vm15 = vweird.f32 %v1156_v44 }
 0x84f   :  { %v1773_v46 = vpop.eup %1772 }
 0x850   :  { %v1158_v38 = vmul.f32 %v1773_v46, %v1156_v44  ;;  %vm1164_vm14 = vweird.f32 %v1773_v46 }
 0x851   :  { %vm1165_vm3 = vmor %vm1163_vm15, %vm1164_vm14 }
 0x852   :  { %v1159_v47 = vmul.f32 %v1773_v46, %v1158_v38 }
 0x854   :  { %v1160_v40 = vmul.f32 0.5, %v1159_v47 }
 0x856   :  { %v1161_v20 = vsub.f32 1.5, %v1160_v40 }
 0x858   :  { %v1162_v45 = vmul.f32 %v1773_v46, %v1161_v20 }
 0x85a   :  { %v1166_v49 = vsel %vm1165_vm3, %v1773_v46, %v1162_v45 }
 0x85b   :  { %v1174_v50 = vmul.f32 %v1166_v49, %v2209_v35  ;;  %v1213_v52 = vmul.f32 %v1166_v49, %v1063_v3  ;;  %v1173_v53 = vmul.f32 %v1166_v49, %v2199_v31  ;;  %v1212_v54 = vmul.f32 %v1166_v49, %v2204_v32 }
 0x85c   :  { %v1172_v55 = vmul.f32 %v1166_v49, %v2189_v27  ;;  %v1211_v56 = vmul.f32 %v1166_v49, %v2194_v29  ;;  %v1171_v59 = vmul.f32 %v1166_v49, %v2179_v15  ;;  %v1210_v62 = vmul.f32 %v1166_v49, %v2184_v18 }
 0x85d   :  { %1774 = vtanh.f32 %v1174_v50  ;;  %v1170_v35 = vmul.f32 %v1166_v49, %v2163_v19  ;;  %v1209_v31 = vmul.f32 %v1166_v49, %v2174_v10  ;;  %v1169_v32 = vmul.f32 %v1166_v49, %v2158_v13 }
 0x85e   :  { %1776 = vtanh.f32 %v1213_v52  ;;  %v1208_v29 = vmul.f32 %v1166_v49, %v2165_v22  ;;  %v1168_v15 = vmul.f32 %v1166_v49, %v2148_v2  ;;  %v1207_v19 = vmul.f32 %v1166_v49, %v2153_v8 }
 0x85f   :  { %1778 = vtanh.f32 %v1173_v53  ;;  %v1167_v13 = vmul.f32 %v1166_v49, %v2139_v58  ;;  %v1206_v22 = vmul.f32 %v1166_v49, %v2143_v61 }
 0x860   :  { %1780 = vtanh.f32 %v1212_v54 }
 0x861   :  { %1782 = vtanh.f32 %v1172_v55 }
 0x862   :  { %1784 = vtanh.f32 %v1211_v56 }
 0x863   :  { %v1775_v3 = vpop.eup %1774  ;;  %1786 = vtanh.f32 %v1171_v59 }
 0x864   :  { %v1777_v27 = vpop.eup %1776  ;;  %1194 = vmatpush.msra.mxu2 %v1775_v3  ;;  %1788 = vtanh.f32 %v1210_v62 }
 0x865   :  { %v1779_v0 = vpop.eup %1778  ;;  %1233 = vmatpush.msrb.mxu3 %v1777_v27  ;;  %1790 = vtanh.f32 %v1170_v35 }
 0x866   :  { %v1781_v18 = vpop.eup %1780  ;;  %1195 = vmatpush.msra.mxu2 %v1779_v0  ;;  %1792 = vtanh.f32 %v1209_v31 }
 0x867   :  { %v1783_v10 = vpop.eup %1782  ;;  %1234 = vmatpush.msrb.mxu3 %v1781_v18  ;;  %1794 = vtanh.f32 %v1169_v32 }
 0x868   :  { %v1785_v6 = vpop.eup %1784  ;;  %1196 = vmatpush.msra.mxu2 %v1783_v10  ;;  %1796 = vtanh.f32 %v1208_v29 }
 0x869   :  { %v1787_v7 = vpop.eup %1786  ;;  %1235 = vmatpush.msrb.mxu3 %v1785_v6  ;;  %1798 = vtanh.f32 %v1168_v15 }
 0x86a   :  { %v1789_v11 = vpop.eup %1788  ;;  %1197 = vmatpush.msra.mxu2 %v1787_v7  ;;  %1800 = vtanh.f32 %v1207_v19 }
 0x86b   :  { %v1791_v2 = vpop.eup %1790  ;;  %1236 = vmatpush.msrb.mxu3 %v1789_v11  ;;  %1802 = vtanh.f32 %v1167_v13 }
 0x86c   :  { %v1793_v8 = vpop.eup %1792  ;;  %1198 = vmatpush.msra.mxu2 %v1791_v2  ;;  %1804 = vtanh.f32 %v1206_v22 }
 0x86d   :  { %v1795_v12 = vpop.eup %1794  ;;  %1237 = vmatpush.msrb.mxu3 %v1793_v8 }
 0x86e   :  { %v1797_v58 = vpop.eup %1796  ;;  %1199 = vmatpush.msra.mxu2 %v1795_v12 }
 0x86f   :  { %v1799_v16 = vpop.eup %1798  ;;  %1238 = vmatpush.msrb.mxu3 %v1797_v58 }
 0x870   :  { %v1801_v17 = vpop.eup %1800  ;;  %1200 = vmatpush.msra.mxu2 %v1799_v16 }
 0x871   :  { %v1803_v61 = vpop.eup %1802  ;;  %1239 = vmatpush.msrb.mxu3 %v1801_v17 }
 0x872   :  { %v1805_v23 = vpop.eup %1804  ;;  %1201 = vmatpush.msra.mxu2 %v1803_v61 }
 0x873   :  { %1240 = vmatpush.msrb.mxu3 %v1805_v23  ;;  %1691 = vmatmul.msk.f32.vlgmr.msra.gmra.mxu2 %vm702_vm10, %v2105_v36 }
 0x874   :  { %1692 = vmatmul.msk.f32.vlgmr.msrb.gmra.mxu3 %vm702_vm10, %v2108_v42  ;;  %1316 = vmatpush.msrb.mxu2 %v1977_v1 }
 0x875   :  { %1413 = vmatpush.msra.mxu3 %v1989_v60 }
 0x8f6   :  { %v1203_v24 = vpop.f32.mrf.mxu2 }
 0x8f7   :  { %v2237_v25 = vadd.f32 %v1203_v24, %v1977_v1  ;;  %v1242_v37 = vpop.f32.mrf.mxu3 }
 0x8f8   :  { %v2240_v33 = vadd.f32 %v1242_v37, %v1989_v60 }
 0x8f9   :  { %1619 = vst.msk [vmem:[%s2382_s7] sm:$0xff] %vm702_vm10, %v2237_v25  ;;  %1245 = vxpose.xlu2.b32.start.end [1/1] (short) (narrow) %v2237_v25, 64 }
 0x8fa   :  { %1712 = vst.msk [vmem:[%s2382_s7 + $0x8] sm:$0xff] %vm702_vm10, %v2240_v33 }
 0x939   :  { %1342 = vxpose.xlu2.b32.start.end [1/1] (short) (narrow) %v2240_v33, 64 }
 0x992   :  { %v1261_v36 = vpop.trf.xlu2 }
 0x993   :  { %1693 = vmatmul.msk.f32.vlgmr.msrb.gmra.mxu2 %vm28_vm0, %v1261_v36 }
 0x99a   :  { %v1262_v42 = vpop.trf.xlu2 }
 0x99b   :  { %1694 = vmatmul.msk.f32.gmra.mxu2 %vm28_vm0, %v1262_v42 }
 0x9a2   :  { %v1263_v30 = vpop.trf.xlu2 }
 0x9a3   :  { %1695 = vmatmul.msk.f32.gmra.mxu2 %vm28_vm0, %v1263_v30 }
 0x9aa   :  { %v1264_v5 = vpop.trf.xlu2 }
 0x9ab   :  { %1696 = vmatmul.msk.f32.gmra.mxu2 %vm28_vm0, %v1264_v5 }
 0x9b2   :  { %v1265_v26 = vpop.trf.xlu2 }
 0x9b3   :  { %1697 = vmatmul.msk.f32.gmra.mxu2 %vm28_vm0, %v1265_v26 }
 0x9ba   :  { %v1266_v57 = vpop.trf.xlu2 }
 0x9bb   :  { %1698 = vmatmul.msk.f32.gmra.mxu2 %vm28_vm0, %v1266_v57 }
 0x9c2   :  { %v1267_v48 = vpop.trf.xlu2 }
 0x9c3   :  { %1699 = vmatmul.msk.f32.gmra.mxu2 %vm28_vm0, %v1267_v48 }
 0x9ca   :  { %v1268_v14 = vpop.trf.xlu2 }
 0x9cb   :  { %1700 = vmatmul.msk.f32.gmra.mxu2 %vm28_vm0, %v1268_v14 }
 0x9d2   :  { %v1358_v4 = vpop.trf.xlu2 }
 0x9d3   :  { %1701 = vmatmul.msk.f32.vlgmr.msra.gmra.mxu3 %vm28_vm0, %v1358_v4 }
 0x9da   :  { %v1359_v28 = vpop.trf.xlu2 }
 0x9db   :  { %1702 = vmatmul.msk.f32.gmra.mxu3 %vm28_vm0, %v1359_v28 }
 0x9e2   :  { %v1360_v21 = vpop.trf.xlu2 }
 0x9e3   :  { %1703 = vmatmul.msk.f32.gmra.mxu3 %vm28_vm0, %v1360_v21 }
 0x9ea   :  { %v1361_v51 = vpop.trf.xlu2 }
 0x9eb   :  { %1704 = vmatmul.msk.f32.gmra.mxu3 %vm28_vm0, %v1361_v51 }
 0x9f2   :  { %v1362_v9 = vpop.trf.xlu2 }
 0x9f3   :  { %1705 = vmatmul.msk.f32.gmra.mxu3 %vm28_vm0, %v1362_v9 }
 0x9fa   :  { %v1363_v63 = vpop.trf.xlu2 }
 0x9fb   :  { %1706 = vmatmul.msk.f32.gmra.mxu3 %vm28_vm0, %v1363_v63 }
 0xa02   :  { %v1364_v43 = vpop.trf.xlu2 }
 0xa03   :  { %1707 = vmatmul.msk.f32.gmra.mxu3 %vm28_vm0, %v1364_v43 }
 0xa0a   :  { %v1365_v34 = vpop.trf.xlu2 }
 0xa0b   :  { %1708 = vmatmul.msk.f32.gmra.mxu3 %vm28_vm0, %v1365_v34 }
 0xa16   :  { %v2270_v39 = vpop.f32.mrf.mxu2 }
 0xa17   :  { %v1439_v41 = vmul.f32 %v2270_v39, %v2270_v39 }
 0xa19   :  { %v1447_v44 = vsel %vm702_vm10, %v1439_v41, 0.0 }
 0xa1a   :  { %1448 = vadd.xlane.f32.xlu1 %v1447_v44 }
 0xa1e   :  { %v2275_v46 = vpop.f32.mrf.mxu2 }
 0xa1f   :  { %v1440_v62 = vmul.f32 %v2275_v46, %v2275_v46 }
 0xa21   :  { %v1450_v31 = vsel %vm702_vm10, %v1440_v62, 0.0 }
 0xa26   :  { %v2277_v38 = vpop.f32.mrf.mxu2 }
 0xa27   :  { %v1441_v29 = vmul.f32 %v2277_v38, %v2277_v38 }
 0xa29   :  { %v1453_v15 = vsel %vm702_vm10, %v1441_v29, 0.0 }
 0xa2e   :  { %v2279_v47 = vpop.f32.mrf.mxu2 }
 0xa2f   :  { %v1442_v40 = vmul.f32 %v2279_v47, %v2279_v47 }
 0xa31   :  { %v1456_v20 = vsel %vm702_vm10, %v1442_v40, 0.0 }
 0xa32   :  { %1457 = vadd.xlane.f32.xlu0 %v1456_v20 }
 0xa36   :  { %v2284_v45 = vpop.f32.mrf.mxu2 }
 0xa37   :  { %v1443_v49 = vmul.f32 %v2284_v45, %v2284_v45 }
 0xa39   :  { %v1459_v50 = vsel %vm702_vm10, %v1443_v49, 0.0 }
 0xa3a   :  { %1460 = vadd.xlane.f32.xlu0 %v1459_v50 }
 0xa3e   :  { %v2289_v52 = vpop.f32.mrf.mxu2 }
 0xa3f   :  { %v1444_v53 = vmul.f32 %v2289_v52, %v2289_v52 }
 0xa41   :  { %v1462_v54 = vsel %vm702_vm10, %v1444_v53, 0.0 }
 0xa42   :  { %1463 = vadd.xlane.f32.xlu2 %v1462_v54 }
 0xa46   :  { %v2333_v58 = vpop.f32.mrf.mxu2 }
 0xa47   :  { %v1445_v61 = vmul.f32 %v2333_v58, %v2333_v58 }
 0xa49   :  { %v1465_v37 = vsel %vm702_vm10, %v1445_v61, 0.0 }
 0xa4e   :  { %v1339_v42 = vpop.f32.mrf.mxu2 }
 0xa4f   :  { %v1446_v30 = vmul.f32 %v1339_v42, %v1339_v42 }
 0xa51   :  { %v1468_v5 = vsel %vm702_vm10, %v1446_v30, 0.0 }
 0xa56   :  { %v2294_v55 = vpop.f32.mrf.mxu3 }
 0xa57   :  { %v1484_v56 = vmul.f32 %v2294_v55, %v2294_v55 }
 0xa59   :  { %v1492_v59 = vsel %vm702_vm10, %v1484_v56, 0.0 }
 0xa5a   :  { %1493 = vadd.xlane.f32.xlu1 %v1492_v59 }
 0xa5e   :  { %v2301_v35 = vpop.f32.mrf.mxu3 }
 0xa5f   :  { %v1485_v3 = vmul.f32 %v2301_v35, %v2301_v35 }
 0xa61   :  { %v1495_v27 = vsel %vm702_vm10, %v1485_v3, 0.0 }
 0xa62   :  { %1451 = vadd.xlane.f32.xlu1 %v1450_v31 }
 0xa66   :  { %v2306_v32 = vpop.f32.mrf.mxu3 }
 0xa67   :  { %v1486_v18 = vmul.f32 %v2306_v32, %v2306_v32 }
 0xa69   :  { %v1498_v10 = vsel %vm702_vm10, %v1486_v18, 0.0 }
 0xa6a   :  { %1496 = vadd.xlane.f32.xlu1 %v1495_v27 }
 0xa6e   :  { %v2311_v0 = vpop.f32.mrf.mxu3 }
 0xa6f   :  { %v1487_v13 = vmul.f32 %v2311_v0, %v2311_v0 }
 0xa71   :  { %v1501_v7 = vsel %vm702_vm10, %v1487_v13, 0.0 }
 0xa72   :  { %1454 = vadd.xlane.f32.xlu1 %v1453_v15 }
 0xa76   :  { %v2316_v19 = vpop.f32.mrf.mxu3 }
 0xa77   :  { %v1488_v2 = vmul.f32 %v2316_v19, %v2316_v19 }
 0xa79   :  { %v1504_v16 = vsel %vm702_vm10, %v1488_v2, 0.0 }
 0xa7a   :  { %1499 = vadd.xlane.f32.xlu1 %v1498_v10 }
 0xa7e   :  { %v2321_v6 = vpop.f32.mrf.mxu3 }
 0xa7f   :  { %v1489_v22 = vmul.f32 %v2321_v6, %v2321_v6 }
 0xa81   :  { %v1507_v11 = vsel %vm702_vm10, %v1489_v22, 0.0 }
 0xa82   :  { %1502 = vadd.xlane.f32.xlu1 %v1501_v7  ;;  %1508 = vadd.xlane.f32.xlu0 %v1507_v11 }
 0xa86   :  { %v2329_v8 = vpop.f32.mrf.mxu3 }
 0xa87   :  { %v1490_v12 = vmul.f32 %v2329_v8, %v2329_v8 }
 0xa89   :  { %v1510_v17 = vsel %vm702_vm10, %v1490_v12, 0.0 }
 0xa8a   :  { %1505 = vadd.xlane.f32.xlu1 %v1504_v16  ;;  %1511 = vadd.xlane.f32.xlu0 %v1510_v17 }
 0xa8d   :  { %v1449_v26 = vpop.xlane.xlu1 %1448 }
 0xa8e   :  { %v2339_v23 = vpop.f32.mrf.mxu3 }
 0xa8f   :  { %v1491_v24 = vmul.f32 %v2339_v23, %v2339_v23 }
 0xa91   :  { %v1513_v36 = vsel %vm702_vm10, %v1491_v24, 0.0 }
 0xa92   :  { %1466 = vadd.xlane.f32.xlu1 %v1465_v37  ;;  %1514 = vadd.xlane.f32.xlu0 %v1513_v36 }
 0xa9a   :  { %1469 = vadd.xlane.f32.xlu1 %v1468_v5 }
 0xaa5   :  { %v1458_v4 = vpop.xlane.xlu0 %1457 }
 0xaad   :  { %v1461_v21 = vpop.xlane.xlu0 %1460 }
 0xab5   :  { %v1464_v29 = vpop.xlane.xlu2 %1463 }
 0xacd   :  { %v1494_v57 = vpop.xlane.xlu1 %1493 }
 0xad5   :  { %v1452_v48 = vpop.xlane.xlu1 %1451 }
 0xad6   :  { %v1471_v41 = vadd.f32 %v1452_v48, %v1449_v26 }
 0xadd   :  { %v1497_v14 = vpop.xlane.xlu1 %1496 }
 0xade   :  { %v1516_v43 = vadd.f32 %v1497_v14, %v1494_v57 }
 0xae5   :  { %v1455_v28 = vpop.xlane.xlu1 %1454 }
 0xae6   :  { %v1472_v49 = vadd.f32 %v1471_v41, %v1455_v28 }
 0xae8   :  { %v1473_v54 = vadd.f32 %v1472_v49, %v1458_v4 }
 0xaea   :  { %v1474_v31 = vadd.f32 %v1473_v54, %v1461_v21 }
 0xaec   :  { %v1475_v15 = vadd.f32 %v1474_v31, %v1464_v29 }
 0xaed   :  { %v1500_v51 = vpop.xlane.xlu1 %1499 }
 0xaee   :  { %v1517_v34 = vadd.f32 %v1516_v43, %v1500_v51 }
 0xaf5   :  { %v1503_v9 = vpop.xlane.xlu1 %1502  ;;  %v1509_v63 = vpop.xlane.xlu0 %1508 }
 0xaf6   :  { %v1518_v44 = vadd.f32 %v1517_v34, %v1503_v9 }
 0xafd   :  { %v1506_v40 = vpop.xlane.xlu1 %1505  ;;  %v1512_v20 = vpop.xlane.xlu0 %1511 }
 0xafe   :  { %v1519_v50 = vadd.f32 %v1518_v44, %v1506_v40 }
 0xb00   :  { %v1520_v53 = vadd.f32 %v1519_v50, %v1509_v63 }
 0xb02   :  { %v1521_v56 = vadd.f32 %v1520_v53, %v1512_v20 }
 0xb05   :  { %v1467_v59 = vpop.xlane.xlu1 %1466  ;;  %v1515_v62 = vpop.xlane.xlu0 %1514 }
 0xb06   :  { %v1522_v3 = vadd.f32 %v1521_v56, %v1515_v62  ;;  %v1476_v10 = vadd.f32 %v1475_v15, %v1467_v59 }
 0xb08   :  { %v1523_v27 = vrot.slane %v1522_v3, 4 }
 0xb0a   :  { %v1524_v18 = vadd.f32 %v1523_v27, %v1522_v3 }
 0xb0c   :  { %v1525_v22 = vrot.slane %v1524_v18, 2 }
 0xb0d   :  { %v1470_v13 = vpop.xlane.xlu1 %1469 }
 0xb0e   :  { %v1477_v7 = vadd.f32 %v1476_v10, %v1470_v13  ;;  %v1526_v2 = vadd.f32 %v1525_v22, %v1524_v18 }
 0xb10   :  { %v1478_v11 = vrot.slane %v1477_v7, 4  ;;  %v1527_v17 = vrot.slane %v1526_v2, 1 }
 0xb12   :  { %v1479_v12 = vadd.f32 %v1478_v11, %v1477_v7  ;;  %v1528_v37 = vadd.f32 %v1527_v17, %v1526_v2 }
 0xb14   :  { %v1480_v16 = vrot.slane %v1479_v12, 2 }
 0xb16   :  { %v1481_v61 = vadd.f32 %v1480_v16, %v1479_v12 }
 0xb18   :  { %v1482_v24 = vrot.slane %v1481_v61, 1 }
 0xb1a   :  { %v1483_v36 = vadd.f32 %v1482_v24, %v1481_v61 }
 0xb1c   :  { %v1529_v30 = vadd.f32 %v1528_v37, %v1483_v36 }
 0xb1e   :  { %1806 = vrsqrt.f32 %v1529_v30  ;;  %vm1536_vm4 = vweird.f32 %v1529_v30 }
 0xb24   :  { %v1807_v5 = vpop.eup %1806 }
 0xb25   :  { %v1531_v26 = vmul.f32 %v1807_v5, %v1529_v30  ;;  %vm1537_vm0 = vweird.f32 %v1807_v5 }
 0xb26   :  { %vm1538_vm1 = vmor %vm1536_vm4, %vm1537_vm0 }
 0xb27   :  { %v1532_v57 = vmul.f32 %v1807_v5, %v1531_v26 }
 0xb29   :  { %v1533_v48 = vmul.f32 0.5, %v1532_v57 }
 0xb2b   :  { %v1534_v14 = vsub.f32 1.5, %v1533_v48 }
 0xb2d   :  { %v1535_v4 = vmul.f32 %v1807_v5, %v1534_v14 }
 0xb2f   :  { %v1539_v28 = vsel %vm1538_vm1, %v1807_v5, %v1535_v4 }
 0xb30   :  { %v1547_v21 = vmul.f32 %v1539_v28, %v1339_v42  ;;  %v1586_v51 = vmul.f32 %v1539_v28, %v2339_v23  ;;  %v1546_v9 = vmul.f32 %v1539_v28, %v2333_v58  ;;  %v1585_v63 = vmul.f32 %v1539_v28, %v2329_v8 }
 0xb31   :  { %v1545_v43 = vmul.f32 %v1539_v28, %v2289_v52  ;;  %v1584_v34 = vmul.f32 %v1539_v28, %v2321_v6  ;;  %v1544_v41 = vmul.f32 %v1539_v28, %v2284_v45  ;;  %v1583_v44 = vmul.f32 %v1539_v28, %v2316_v19 }
 0xb32   :  { %1808 = vtanh.f32 %v1547_v21  ;;  %v1543_v42 = vmul.f32 %v1539_v28, %v2279_v47  ;;  %v1582_v58 = vmul.f32 %v1539_v28, %v2311_v0  ;;  %v1542_v8 = vmul.f32 %v1539_v28, %v2277_v38 }
 0xb33   :  { %1810 = vtanh.f32 %v1586_v51  ;;  %v1581_v6 = vmul.f32 %v1539_v28, %v2306_v32  ;;  %v1541_v45 = vmul.f32 %v1539_v28, %v2275_v46  ;;  %v1580_v47 = vmul.f32 %v1539_v28, %v2301_v35 }
 0xb34   :  { %1812 = vtanh.f32 %v1546_v9  ;;  %v1540_v38 = vmul.f32 %v1539_v28, %v2270_v39  ;;  %v1579_v32 = vmul.f32 %v1539_v28, %v2294_v55 }
 0xb35   :  { %1814 = vtanh.f32 %v1585_v63 }
 0xb36   :  { %1816 = vtanh.f32 %v1545_v43 }
 0xb37   :  { %1818 = vtanh.f32 %v1584_v34 }
 0xb38   :  { %v1809_v23 = vpop.eup %1808  ;;  %1820 = vtanh.f32 %v1544_v41 }
 0xb39   :  { %v1811_v52 = vpop.eup %1810  ;;  %1567 = vmatpush.msrb.mxu0 %v1809_v23  ;;  %1822 = vtanh.f32 %v1583_v44 }
 0xb3a   :  { %v1813_v40 = vpop.eup %1812  ;;  %1606 = vmatpush.msra.mxu1 %v1811_v52  ;;  %1824 = vtanh.f32 %v1543_v42 }
 0xb3b   :  { %v1815_v19 = vpop.eup %1814  ;;  %1568 = vmatpush.msrb.mxu0 %v1813_v40  ;;  %1826 = vtanh.f32 %v1582_v58 }
 0xb3c   :  { %v1817_v0 = vpop.eup %1816  ;;  %1607 = vmatpush.msra.mxu1 %v1815_v19  ;;  %1828 = vtanh.f32 %v1542_v8 }
 0xb3d   :  { %v1819_v20 = vpop.eup %1818  ;;  %1569 = vmatpush.msrb.mxu0 %v1817_v0  ;;  %1830 = vtanh.f32 %v1581_v6 }
 0xb3e   :  { %v1821_v49 = vpop.eup %1820  ;;  %1608 = vmatpush.msra.mxu1 %v1819_v20  ;;  %1832 = vtanh.f32 %v1541_v45 }
 0xb3f   :  { %v1823_v50 = vpop.eup %1822  ;;  %1570 = vmatpush.msrb.mxu0 %v1821_v49  ;;  %1834 = vtanh.f32 %v1580_v47 }
 0xb40   :  { %v1825_v46 = vpop.eup %1824  ;;  %1609 = vmatpush.msra.mxu1 %v1823_v50  ;;  %1836 = vtanh.f32 %v1540_v38 }
 0xb41   :  { %v1827_v35 = vpop.eup %1826  ;;  %1571 = vmatpush.msrb.mxu0 %v1825_v46  ;;  %1838 = vtanh.f32 %v1579_v32 }
 0xb42   :  { %v1829_v53 = vpop.eup %1828  ;;  %1610 = vmatpush.msra.mxu1 %v1827_v35 }
 0xb43   :  { %v1831_v39 = vpop.eup %1830  ;;  %1572 = vmatpush.msrb.mxu0 %v1829_v53 }
 0xb44   :  { %v1833_v54 = vpop.eup %1832  ;;  %1611 = vmatpush.msra.mxu1 %v1831_v39 }
 0xb45   :  { %v1835_v56 = vpop.eup %1834  ;;  %1573 = vmatpush.msrb.mxu0 %v1833_v54 }
 0xb46   :  { %v1837_v55 = vpop.eup %1836  ;;  %1612 = vmatpush.msra.mxu1 %v1835_v56 }
 0xb47   :  { %v1839_v59 = vpop.eup %1838  ;;  %1574 = vmatpush.msrb.mxu0 %v1837_v55 }
 0xb48   :  { %1613 = vmatpush.msra.mxu1 %v1839_v59  ;;  %1709 = vmatmul.msk.f32.vlgmr.msrb.gmra.mxu0 %vm702_vm10, %v2237_v25 }
 0xb49   :  { %1710 = vmatmul.msk.f32.vlgmr.msra.gmra.mxu1 %vm702_vm10, %v2240_v33 }
 0xbc5   :  { %v1576_v62 = vpop.f32.mrf.mxu0 }
 0xbc6   :  { %v1577_v31 = vadd.f32 %v1576_v62, %v1977_v1  ;;  %v1615_v3 = vpop.f32.mrf.mxu1 }
 0xbc7   :  { %v1616_v27 = vadd.f32 %v1615_v3, %v1989_v60 }
 0xbc8   :  { %1620 = vst.msk [vmem:[%s2383_s8] sm:$0xff] %vm702_vm10, %v1577_v31 }
 0xbc9   :  { %1713 = vst.msk [vmem:[%s2383_s8 + $0x8] sm:$0xff] %vm702_vm10, %v1616_v27 }

</bundles_post_ra>
